<compile_context>
chip_gen: v5e
topology: v5e:2x2
jax: 0.10.0
libtpu: 0.0.40
codegen_flags: <defaults>
</compile_context>

<pallas_src>
import functools

import jax
import jax.numpy as jnp
from jax import lax
from jax.experimental import pallas as pl
from jax.experimental.pallas import tpu as pltpu


def _fused_upsample_conv_kernel(x_ref, w_ref, b_ref, o_ref, xp_ref, *, row_tile):
    # x_ref : (1, H, W, C)      original-resolution input (one batch element)
    # w_ref : (9*C, 4*C)        folded phase weights (rows grouped per tap)
    # b_ref : (1, 4*C)          bias replicated per phase
    # o_ref : (1, H, W, 4*C)    phase-grouped output; last dim = (ph, pw, cout)
    # xp_ref: (H+2, W+2, C)     VMEM scratch: zero-padded copy of the input
    _, H, W, C4 = o_ref.shape
    C = x_ref.shape[-1]

    # Fused pad=1: zero the scratch, copy the tile into its interior.
    xp_ref[...] = jnp.zeros_like(xp_ref)
    xp_ref[1:H + 1, 1:W + 1, :] = x_ref[0]

    bias = b_ref[...].astype(jnp.float32)               # (1, 4C)

    # Row-chunked accumulation keeps the f32 accumulator small.
    n_chunks = H // row_tile
    for r in range(n_chunks):
        r0 = r * row_tile
        acc = jnp.zeros((row_tile * W, C4), dtype=jnp.float32)
        # 9 source-resolution taps (dh, dw) in {-1,0,1}^2, offset by +1 (pad).
        for dh in range(3):
            for dw in range(3):
                t = dh * 3 + dw
                patch = xp_ref[r0 + dh:r0 + dh + row_tile, dw:dw + W, :]
                patch = patch.reshape(row_tile * W, C)
                acc = acc + jnp.dot(patch, w_ref[t * C:(t + 1) * C, :],
                                    preferred_element_type=jnp.float32)
        acc = acc + bias
        o_ref[0, r0:r0 + row_tile, :, :] = (
            acc.reshape(row_tile, W, C4).astype(o_ref.dtype))


def _fold_phase_weights(w_torch):
    """Fold torch conv weights (Cout, Cin, 3, 3) into a (9*Cin, 4*Cout) matrix.

    For output pixel (2h+ph, 2w+pw) of the upsampled conv, the 3x3 tap
    (kh, kw) reads source pixel (h + (ph+kh-1)//2, w + (pw+kw-1)//2).
    Rows of the result are the 9 source offsets (dh, dw) in {-1,0,1}^2
    (each x Cin); columns are the 4 phases (ph, pw) (each x Cout).
    """
    C = w_torch.shape[0]
    wf = jnp.zeros((3, 3, C, 2, 2, C), dtype=w_torch.dtype)
    for ph in range(2):
        for pw in range(2):
            for kh in range(3):
                for kw in range(3):
                    dh = (ph + kh - 1) // 2      # in {-1, 0, 1}
                    dw = (pw + kw - 1) // 2
                    wf = wf.at[dh + 1, dw + 1, :, ph, pw, :].add(
                        w_torch[:, :, kh, kw].T)          # (Cin, Cout)
    return wf.reshape(9 * C, 4 * C)


def upsample_forward(x_nchw, w_torch, b, *, row_tile=None):
    """x_nchw: (N, C, H, W); w_torch: (C, C, 3, 3) PyTorch layout; b: (C,)."""
    N, C, H, W = x_nchw.shape
    x = jnp.transpose(x_nchw, (0, 2, 3, 1))                  # (N, H, W, C)

    w_fold = _fold_phase_weights(w_torch).astype(x.dtype)    # (9C, 4C)
    b4 = jnp.tile(b, 4).reshape(1, 4 * C).astype(x.dtype)    # (1, 4C)

    if row_tile is None:
        row_tile = min(H, 8)
    assert H % row_tile == 0, "H must be divisible by the row tile"

    kernel = functools.partial(_fused_upsample_conv_kernel, row_tile=row_tile)

    out_phase = pl.pallas_call(
        kernel,
        out_shape=jax.ShapeDtypeStruct((N, H, W, 4 * C), x.dtype),
        grid_spec=pltpu.PrefetchScalarGridSpec(
            num_scalar_prefetch=0,
            grid=(N,),
            in_specs=[
                pl.BlockSpec((1, H, W, C), lambda n: (n, 0, 0, 0)),
                pl.BlockSpec((9 * C, 4 * C), lambda n: (0, 0)),
                pl.BlockSpec((1, 4 * C), lambda n: (0, 0)),
            ],
            out_specs=pl.BlockSpec((1, H, W, 4 * C), lambda n: (n, 0, 0, 0)),
            scratch_shapes=[pltpu.VMEM((H + 2, W + 2, C), x.dtype)],
        ),
        compiler_params=pltpu.CompilerParams(
            dimension_semantics=("parallel",)),
    )(x, w_fold, b4)

    # De-interleave phases: (N,H,W,2,2,C) -> (N,2H,2W,C) -> NCHW.
    out = out_phase.reshape(N, H, W, 2, 2, C)
    out = jnp.transpose(out, (0, 1, 3, 2, 4, 5)).reshape(N, 2 * H, 2 * W, C)
    return jnp.transpose(out, (0, 3, 1, 2))


def reference_forward(x_nchw, w_torch, b):
    """Pure-JAX reference (nearest 2x upsample + conv2d, pad=1)."""
    x = jnp.repeat(jnp.repeat(x_nchw, 2, axis=2), 2, axis=3)
    y = lax.conv_general_dilated(
        x, w_torch, window_strides=(1, 1), padding=((1, 1), (1, 1)),
        dimension_numbers=("NCHW", "OIHW", "NCHW"))
    return y + b.reshape(1, -1, 1, 1)


if __name__ == "__main__":
    key = jax.random.PRNGKey(0)
    k_x, k_w, k_b = jax.random.split(key, 3)

    N, C, H, W = 2, 4, 16, 16
    x = jax.random.normal(k_x, (N, C, H, W), dtype=jnp.float32)

    # deterministic init mimicking nn.Conv2d defaults (uniform in +/- 1/sqrt(fan_in))
    fan_in = C * 3 * 3
    bound = 1.0 / (fan_in ** 0.5)
    w_torch = jax.random.uniform(k_w, (C, C, 3, 3), jnp.float32, -bound, bound)
    b = jax.random.uniform(k_b, (C,), jnp.float32, -bound, bound)

    out = jax.block_until_ready(upsample_forward(x, w_torch, b))

    ref = jax.block_until_ready(reference_forward(x, w_torch, b))
    assert out.shape == (N, C, 2 * H, 2 * W)
    assert jnp.allclose(out, ref, atol=1e-4, rtol=1e-4)

    print("KERNEL_OK")
</pallas_src>

<mosaic_0001>
module attributes {stable_mosaic.version = 11 : i64} {
  func.func @_fused_upsample_conv_kernel(%arg0: i32, %arg1: memref<1x16x16x4xf32, #tpu.memory_space<vmem>>, %arg2: memref<36x16xf32, #tpu.memory_space<vmem>>, %arg3: memref<1x16xf32, #tpu.memory_space<vmem>>, %arg4: memref<1x16x16x16xf32, #tpu.memory_space<vmem>>, %arg5: memref<18x18x4xf32, #tpu.memory_space<vmem>>) attributes {dimension_semantics = [#tpu.dimension_semantics<parallel>], iteration_bounds = array<i64: 2>, scalar_prefetch = 0 : i64, scratch_operands = 1 : i64, tpu.core_type = #tpu.core_type<tc>, window_params = [{transform_indices = @transform_0, window_bounds = array<i64: 1, 16, 16, 4>}, {pipeline_mode = #tpu.pipeline_mode<synchronous>, transform_indices = @transform_1, window_bounds = array<i64: 36, 16>}, {pipeline_mode = #tpu.pipeline_mode<synchronous>, transform_indices = @transform_2, window_bounds = array<i64: 1, 16>}, {transform_indices = @transform_3, window_bounds = array<i64: 1, 16, 16, 16>}]} {
    %cst = arith.constant 0.000000e+00 : f32
    %0 = vector.broadcast %cst : f32 to vector<18x18x4xf32>
    %c0 = arith.constant 0 : index
    %c0_0 = arith.constant 0 : index
    %c0_1 = arith.constant 0 : index
    %1 = vector.load %arg5[%c0, %c0_0, %c0_1] : memref<18x18x4xf32, #tpu.memory_space<vmem>>, vector<18x18x4xf32>
    tpu.vector_store %arg5[%c0, %c0_0, %c0_1], %0 {strides = array<i32>} : memref<18x18x4xf32, #tpu.memory_space<vmem>>, vector<18x18x4xf32>,
    %c0_2 = arith.constant 0 : index
    %c0_3 = arith.constant 0 : index
    %c0_4 = arith.constant 0 : index
    %c0_5 = arith.constant 0 : index
    %2 = vector.load %arg1[%c0_2, %c0_3, %c0_4, %c0_5] : memref<1x16x16x4xf32, #tpu.memory_space<vmem>>, vector<1x16x16x4xf32>
    %3 = vector.shape_cast %2 : vector<1x16x16x4xf32> to vector<16x16x4xf32>
    %c1 = arith.constant 1 : index
    %c1_6 = arith.constant 1 : index
    %c0_7 = arith.constant 0 : index
    %4 = vector.load %arg5[%c1, %c1_6, %c0_7] : memref<18x18x4xf32, #tpu.memory_space<vmem>>, vector<16x16x4xf32>
    tpu.vector_store %arg5[%c1, %c1_6, %c0_7], %3 {strides = array<i32>} : memref<18x18x4xf32, #tpu.memory_space<vmem>>, vector<16x16x4xf32>,
    %c0_8 = arith.constant 0 : index
    %c0_9 = arith.constant 0 : index
    %5 = vector.load %arg3[%c0_8, %c0_9] : memref<1x16xf32, #tpu.memory_space<vmem>>, vector<1x16xf32>
    %cst_10 = arith.constant 0.000000e+00 : f32
    %6 = vector.broadcast %cst_10 : f32 to vector<128x16xf32>
    %c0_11 = arith.constant 0 : index
    %c0_12 = arith.constant 0 : index
    %c0_13 = arith.constant 0 : index
    %7 = vector.load %arg5[%c0_11, %c0_12, %c0_13] : memref<18x18x4xf32, #tpu.memory_space<vmem>>, vector<8x16x4xf32>
    %8 = vector.shape_cast %7 : vector<8x16x4xf32> to vector<128x4xf32>
    %c0_14 = arith.constant 0 : index
    %c0_15 = arith.constant 0 : index
    %9 = vector.load %arg2[%c0_14, %c0_15] : memref<36x16xf32, #tpu.memory_space<vmem>>, vector<4x16xf32>
    %cst_16 = arith.constant dense<0.000000e+00> : vector<128x16xf32>
    %10 = tpu.matmul %8, %9, %cst_16 {dimension_numbers = #tpu.dot_dimension_numbers<[1], [0], [0], [1], [0, 0, 1, 1], [], []>} : vector<128x4xf32>, vector<4x16xf32>, vector<128x16xf32> -> vector<128x16xf32>
    %11 = arith.addf %6, %10 : vector<128x16xf32>
    %c0_17 = arith.constant 0 : index
    %c1_18 = arith.constant 1 : index
    %c0_19 = arith.constant 0 : index
    %12 = vector.load %arg5[%c0_17, %c1_18, %c0_19] : memref<18x18x4xf32, #tpu.memory_space<vmem>>, vector<8x16x4xf32>
    %13 = vector.shape_cast %12 : vector<8x16x4xf32> to vector<128x4xf32>
    %c4 = arith.constant 4 : index
    %c0_20 = arith.constant 0 : index
    %14 = vector.load %arg2[%c4, %c0_20] : memref<36x16xf32, #tpu.memory_space<vmem>>, vector<4x16xf32>
    %cst_21 = arith.constant dense<0.000000e+00> : vector<128x16xf32>
    %15 = tpu.matmul %13, %14, %cst_21 {dimension_numbers = #tpu.dot_dimension_numbers<[1], [0], [0], [1], [0, 0, 1, 1], [], []>} : vector<128x4xf32>, vector<4x16xf32>, vector<128x16xf32> -> vector<128x16xf32>
    %16 = arith.addf %11, %15 : vector<128x16xf32>
    %c0_22 = arith.constant 0 : index
    %c2 = arith.constant 2 : index
    %c0_23 = arith.constant 0 : index
    %17 = vector.load %arg5[%c0_22, %c2, %c0_23] : memref<18x18x4xf32, #tpu.memory_space<vmem>>, vector<8x16x4xf32>
    %18 = vector.shape_cast %17 : vector<8x16x4xf32> to vector<128x4xf32>
    %c8 = arith.constant 8 : index
    %c0_24 = arith.constant 0 : index
    %19 = vector.load %arg2[%c8, %c0_24] : memref<36x16xf32, #tpu.memory_space<vmem>>, vector<4x16xf32>
    %cst_25 = arith.constant dense<0.000000e+00> : vector<128x16xf32>
    %20 = tpu.matmul %18, %19, %cst_25 {dimension_numbers = #tpu.dot_dimension_numbers<[1], [0], [0], [1], [0, 0, 1, 1], [], []>} : vector<128x4xf32>, vector<4x16xf32>, vector<128x16xf32> -> vector<128x16xf32>
    %21 = arith.addf %16, %20 : vector<128x16xf32>
    %c1_26 = arith.constant 1 : index
    %c0_27 = arith.constant 0 : index
    %c0_28 = arith.constant 0 : index
    %22 = vector.load %arg5[%c1_26, %c0_27, %c0_28] : memref<18x18x4xf32, #tpu.memory_space<vmem>>, vector<8x16x4xf32>
    %23 = vector.shape_cast %22 : vector<8x16x4xf32> to vector<128x4xf32>
    %c12 = arith.constant 12 : index
    %c0_29 = arith.constant 0 : index
    %24 = vector.load %arg2[%c12, %c0_29] : memref<36x16xf32, #tpu.memory_space<vmem>>, vector<4x16xf32>
    %cst_30 = arith.constant dense<0.000000e+00> : vector<128x16xf32>
    %25 = tpu.matmul %23, %24, %cst_30 {dimension_numbers = #tpu.dot_dimension_numbers<[1], [0], [0], [1], [0, 0, 1, 1], [], []>} : vector<128x4xf32>, vector<4x16xf32>, vector<128x16xf32> -> vector<128x16xf32>
    %26 = arith.addf %21, %25 : vector<128x16xf32>
    %c1_31 = arith.constant 1 : index
    %c1_32 = arith.constant 1 : index
    %c0_33 = arith.constant 0 : index
    %27 = vector.load %arg5[%c1_31, %c1_32, %c0_33] : memref<18x18x4xf32, #tpu.memory_space<vmem>>, vector<8x16x4xf32>
    %28 = vector.shape_cast %27 : vector<8x16x4xf32> to vector<128x4xf32>
    %c16 = arith.constant 16 : index
    %c0_34 = arith.constant 0 : index
    %29 = vector.load %arg2[%c16, %c0_34] : memref<36x16xf32, #tpu.memory_space<vmem>>, vector<4x16xf32>
    %cst_35 = arith.constant dense<0.000000e+00> : vector<128x16xf32>
    %30 = tpu.matmul %28, %29, %cst_35 {dimension_numbers = #tpu.dot_dimension_numbers<[1], [0], [0], [1], [0, 0, 1, 1], [], []>} : vector<128x4xf32>, vector<4x16xf32>, vector<128x16xf32> -> vector<128x16xf32>
    %31 = arith.addf %26, %30 : vector<128x16xf32>
    %c1_36 = arith.constant 1 : index
    %c2_37 = arith.constant 2 : index
    %c0_38 = arith.constant 0 : index
    %32 = vector.load %arg5[%c1_36, %c2_37, %c0_38] : memref<18x18x4xf32, #tpu.memory_space<vmem>>, vector<8x16x4xf32>
    %33 = vector.shape_cast %32 : vector<8x16x4xf32> to vector<128x4xf32>
    %c20 = arith.constant 20 : index
    %c0_39 = arith.constant 0 : index
    %34 = vector.load %arg2[%c20, %c0_39] : memref<36x16xf32, #tpu.memory_space<vmem>>, vector<4x16xf32>
    %cst_40 = arith.constant dense<0.000000e+00> : vector<128x16xf32>
    %35 = tpu.matmul %33, %34, %cst_40 {dimension_numbers = #tpu.dot_dimension_numbers<[1], [0], [0], [1], [0, 0, 1, 1], [], []>} : vector<128x4xf32>, vector<4x16xf32>, vector<128x16xf32> -> vector<128x16xf32>
    %36 = arith.addf %31, %35 : vector<128x16xf32>
    %c2_41 = arith.constant 2 : index
    %c0_42 = arith.constant 0 : index
    %c0_43 = arith.constant 0 : index
    %37 = vector.load %arg5[%c2_41, %c0_42, %c0_43] : memref<18x18x4xf32, #tpu.memory_space<vmem>>, vector<8x16x4xf32>
    %38 = vector.shape_cast %37 : vector<8x16x4xf32> to vector<128x4xf32>
    %c24 = arith.constant 24 : index
    %c0_44 = arith.constant 0 : index
    %39 = vector.load %arg2[%c24, %c0_44] : memref<36x16xf32, #tpu.memory_space<vmem>>, vector<4x16xf32>
    %cst_45 = arith.constant dense<0.000000e+00> : vector<128x16xf32>
    %40 = tpu.matmul %38, %39, %cst_45 {dimension_numbers = #tpu.dot_dimension_numbers<[1], [0], [0], [1], [0, 0, 1, 1], [], []>} : vector<128x4xf32>, vector<4x16xf32>, vector<128x16xf32> -> vector<128x16xf32>
    %41 = arith.addf %36, %40 : vector<128x16xf32>
    %c2_46 = arith.constant 2 : index
    %c1_47 = arith.constant 1 : index
    %c0_48 = arith.constant 0 : index
    %42 = vector.load %arg5[%c2_46, %c1_47, %c0_48] : memref<18x18x4xf32, #tpu.memory_space<vmem>>, vector<8x16x4xf32>
    %43 = vector.shape_cast %42 : vector<8x16x4xf32> to vector<128x4xf32>
    %c28 = arith.constant 28 : index
    %c0_49 = arith.constant 0 : index
    %44 = vector.load %arg2[%c28, %c0_49] : memref<36x16xf32, #tpu.memory_space<vmem>>, vector<4x16xf32>
    %cst_50 = arith.constant dense<0.000000e+00> : vector<128x16xf32>
    %45 = tpu.matmul %43, %44, %cst_50 {dimension_numbers = #tpu.dot_dimension_numbers<[1], [0], [0], [1], [0, 0, 1, 1], [], []>} : vector<128x4xf32>, vector<4x16xf32>, vector<128x16xf32> -> vector<128x16xf32>
    %46 = arith.addf %41, %45 : vector<128x16xf32>
    %c2_51 = arith.constant 2 : index
    %c2_52 = arith.constant 2 : index
    %c0_53 = arith.constant 0 : index
    %47 = vector.load %arg5[%c2_51, %c2_52, %c0_53] : memref<18x18x4xf32, #tpu.memory_space<vmem>>, vector<8x16x4xf32>
    %48 = vector.shape_cast %47 : vector<8x16x4xf32> to vector<128x4xf32>
    %c32 = arith.constant 32 : index
    %c0_54 = arith.constant 0 : index
    %49 = vector.load %arg2[%c32, %c0_54] : memref<36x16xf32, #tpu.memory_space<vmem>>, vector<4x16xf32>
    %cst_55 = arith.constant dense<0.000000e+00> : vector<128x16xf32>
    %50 = tpu.matmul %48, %49, %cst_55 {dimension_numbers = #tpu.dot_dimension_numbers<[1], [0], [0], [1], [0, 0, 1, 1], [], []>} : vector<128x4xf32>, vector<4x16xf32>, vector<128x16xf32> -> vector<128x16xf32>
    %51 = arith.addf %46, %50 : vector<128x16xf32>
    %52 = vector.broadcast %5 : vector<1x16xf32> to vector<128x16xf32>
    %53 = arith.addf %51, %52 : vector<128x16xf32>
    %54 = vector.shape_cast %53 : vector<128x16xf32> to vector<8x16x16xf32>
    %c0_56 = arith.constant 0 : index
    %c0_57 = arith.constant 0 : index
    %c0_58 = arith.constant 0 : index
    %c0_59 = arith.constant 0 : index
    %55 = vector.load %arg4[%c0_56, %c0_57, %c0_58, %c0_59] : memref<1x16x16x16xf32, #tpu.memory_space<vmem>>, vector<1x8x16x16xf32>
    %56 = vector.shape_cast %55 : vector<1x8x16x16xf32> to vector<8x16x16xf32>
    %57 = vector.shape_cast %54 : vector<8x16x16xf32> to vector<1x8x16x16xf32>
    tpu.vector_store %arg4[%c0_56, %c0_57, %c0_58, %c0_59], %57 {strides = array<i32>} : memref<1x16x16x16xf32, #tpu.memory_space<vmem>>, vector<1x8x16x16xf32>,
    %cst_60 = arith.constant 0.000000e+00 : f32
    %58 = vector.broadcast %cst_60 : f32 to vector<128x16xf32>
    %c8_61 = arith.constant 8 : index
    %c0_62 = arith.constant 0 : index
    %c0_63 = arith.constant 0 : index
    %59 = vector.load %arg5[%c8_61, %c0_62, %c0_63] : memref<18x18x4xf32, #tpu.memory_space<vmem>>, vector<8x16x4xf32>
    %60 = vector.shape_cast %59 : vector<8x16x4xf32> to vector<128x4xf32>
    %c0_64 = arith.constant 0 : index
    %c0_65 = arith.constant 0 : index
    %61 = vector.load %arg2[%c0_64, %c0_65] : memref<36x16xf32, #tpu.memory_space<vmem>>, vector<4x16xf32>
    %cst_66 = arith.constant dense<0.000000e+00> : vector<128x16xf32>
    %62 = tpu.matmul %60, %61, %cst_66 {dimension_numbers = #tpu.dot_dimension_numbers<[1], [0], [0], [1], [0, 0, 1, 1], [], []>} : vector<128x4xf32>, vector<4x16xf32>, vector<128x16xf32> -> vector<128x16xf32>
    %63 = arith.addf %58, %62 : vector<128x16xf32>
    %c8_67 = arith.constant 8 : index
    %c1_68 = arith.constant 1 : index
    %c0_69 = arith.constant 0 : index
    %64 = vector.load %arg5[%c8_67, %c1_68, %c0_69] : memref<18x18x4xf32, #tpu.memory_space<vmem>>, vector<8x16x4xf32>
    %65 = vector.shape_cast %64 : vector<8x16x4xf32> to vector<128x4xf32>
    %c4_70 = arith.constant 4 : index
    %c0_71 = arith.constant 0 : index
    %66 = vector.load %arg2[%c4_70, %c0_71] : memref<36x16xf32, #tpu.memory_space<vmem>>, vector<4x16xf32>
    %cst_72 = arith.constant dense<0.000000e+00> : vector<128x16xf32>
    %67 = tpu.matmul %65, %66, %cst_72 {dimension_numbers = #tpu.dot_dimension_numbers<[1], [0], [0], [1], [0, 0, 1, 1], [], []>} : vector<128x4xf32>, vector<4x16xf32>, vector<128x16xf32> -> vector<128x16xf32>
    %68 = arith.addf %63, %67 : vector<128x16xf32>
    %c8_73 = arith.constant 8 : index
    %c2_74 = arith.constant 2 : index
    %c0_75 = arith.constant 0 : index
    %69 = vector.load %arg5[%c8_73, %c2_74, %c0_75] : memref<18x18x4xf32, #tpu.memory_space<vmem>>, vector<8x16x4xf32>
    %70 = vector.shape_cast %69 : vector<8x16x4xf32> to vector<128x4xf32>
    %c8_76 = arith.constant 8 : index
    %c0_77 = arith.constant 0 : index
    %71 = vector.load %arg2[%c8_76, %c0_77] : memref<36x16xf32, #tpu.memory_space<vmem>>, vector<4x16xf32>
    %cst_78 = arith.constant dense<0.000000e+00> : vector<128x16xf32>
    %72 = tpu.matmul %70, %71, %cst_78 {dimension_numbers = #tpu.dot_dimension_numbers<[1], [0], [0], [1], [0, 0, 1, 1], [], []>} : vector<128x4xf32>, vector<4x16xf32>, vector<128x16xf32> -> vector<128x16xf32>
    %73 = arith.addf %68, %72 : vector<128x16xf32>
    %c9 = arith.constant 9 : index
    %c0_79 = arith.constant 0 : index
    %c0_80 = arith.constant 0 : index
    %74 = vector.load %arg5[%c9, %c0_79, %c0_80] : memref<18x18x4xf32, #tpu.memory_space<vmem>>, vector<8x16x4xf32>
    %75 = vector.shape_cast %74 : vector<8x16x4xf32> to vector<128x4xf32>
    %c12_81 = arith.constant 12 : index
    %c0_82 = arith.constant 0 : index
    %76 = vector.load %arg2[%c12_81, %c0_82] : memref<36x16xf32, #tpu.memory_space<vmem>>, vector<4x16xf32>
    %cst_83 = arith.constant dense<0.000000e+00> : vector<128x16xf32>
    %77 = tpu.matmul %75, %76, %cst_83 {dimension_numbers = #tpu.dot_dimension_numbers<[1], [0], [0], [1], [0, 0, 1, 1], [], []>} : vector<128x4xf32>, vector<4x16xf32>, vector<128x16xf32> -> vector<128x16xf32>
    %78 = arith.addf %73, %77 : vector<128x16xf32>
    %c9_84 = arith.constant 9 : index
    %c1_85 = arith.constant 1 : index
    %c0_86 = arith.constant 0 : index
    %79 = vector.load %arg5[%c9_84, %c1_85, %c0_86] : memref<18x18x4xf32, #tpu.memory_space<vmem>>, vector<8x16x4xf32>
    %80 = vector.shape_cast %79 : vector<8x16x4xf32> to vector<128x4xf32>
    %c16_87 = arith.constant 16 : index
    %c0_88 = arith.constant 0 : index
    %81 = vector.load %arg2[%c16_87, %c0_88] : memref<36x16xf32, #tpu.memory_space<vmem>>, vector<4x16xf32>
    %cst_89 = arith.constant dense<0.000000e+00> : vector<128x16xf32>
    %82 = tpu.matmul %80, %81, %cst_89 {dimension_numbers = #tpu.dot_dimension_numbers<[1], [0], [0], [1], [0, 0, 1, 1], [], []>} : vector<128x4xf32>, vector<4x16xf32>, vector<128x16xf32> -> vector<128x16xf32>
    %83 = arith.addf %78, %82 : vector<128x16xf32>
    %c9_90 = arith.constant 9 : index
    %c2_91 = arith.constant 2 : index
    %c0_92 = arith.constant 0 : index
    %84 = vector.load %arg5[%c9_90, %c2_91, %c0_92] : memref<18x18x4xf32, #tpu.memory_space<vmem>>, vector<8x16x4xf32>
    %85 = vector.shape_cast %84 : vector<8x16x4xf32> to vector<128x4xf32>
    %c20_93 = arith.constant 20 : index
    %c0_94 = arith.constant 0 : index
    %86 = vector.load %arg2[%c20_93, %c0_94] : memref<36x16xf32, #tpu.memory_space<vmem>>, vector<4x16xf32>
    %cst_95 = arith.constant dense<0.000000e+00> : vector<128x16xf32>
    %87 = tpu.matmul %85, %86, %cst_95 {dimension_numbers = #tpu.dot_dimension_numbers<[1], [0], [0], [1], [0, 0, 1, 1], [], []>} : vector<128x4xf32>, vector<4x16xf32>, vector<128x16xf32> -> vector<128x16xf32>
    %88 = arith.addf %83, %87 : vector<128x16xf32>
    %c10 = arith.constant 10 : index
    %c0_96 = arith.constant 0 : index
    %c0_97 = arith.constant 0 : index
    %89 = vector.load %arg5[%c10, %c0_96, %c0_97] : memref<18x18x4xf32, #tpu.memory_space<vmem>>, vector<8x16x4xf32>
    %90 = vector.shape_cast %89 : vector<8x16x4xf32> to vector<128x4xf32>
    %c24_98 = arith.constant 24 : index
    %c0_99 = arith.constant 0 : index
    %91 = vector.load %arg2[%c24_98, %c0_99] : memref<36x16xf32, #tpu.memory_space<vmem>>, vector<4x16xf32>
    %cst_100 = arith.constant dense<0.000000e+00> : vector<128x16xf32>
    %92 = tpu.matmul %90, %91, %cst_100 {dimension_numbers = #tpu.dot_dimension_numbers<[1], [0], [0], [1], [0, 0, 1, 1], [], []>} : vector<128x4xf32>, vector<4x16xf32>, vector<128x16xf32> -> vector<128x16xf32>
    %93 = arith.addf %88, %92 : vector<128x16xf32>
    %c10_101 = arith.constant 10 : index
    %c1_102 = arith.constant 1 : index
    %c0_103 = arith.constant 0 : index
    %94 = vector.load %arg5[%c10_101, %c1_102, %c0_103] : memref<18x18x4xf32, #tpu.memory_space<vmem>>, vector<8x16x4xf32>
    %95 = vector.shape_cast %94 : vector<8x16x4xf32> to vector<128x4xf32>
    %c28_104 = arith.constant 28 : index
    %c0_105 = arith.constant 0 : index
    %96 = vector.load %arg2[%c28_104, %c0_105] : memref<36x16xf32, #tpu.memory_space<vmem>>, vector<4x16xf32>
    %cst_106 = arith.constant dense<0.000000e+00> : vector<128x16xf32>
    %97 = tpu.matmul %95, %96, %cst_106 {dimension_numbers = #tpu.dot_dimension_numbers<[1], [0], [0], [1], [0, 0, 1, 1], [], []>} : vector<128x4xf32>, vector<4x16xf32>, vector<128x16xf32> -> vector<128x16xf32>
    %98 = arith.addf %93, %97 : vector<128x16xf32>
    %c10_107 = arith.constant 10 : index
    %c2_108 = arith.constant 2 : index
    %c0_109 = arith.constant 0 : index
    %99 = vector.load %arg5[%c10_107, %c2_108, %c0_109] : memref<18x18x4xf32, #tpu.memory_space<vmem>>, vector<8x16x4xf32>
    %100 = vector.shape_cast %99 : vector<8x16x4xf32> to vector<128x4xf32>
    %c32_110 = arith.constant 32 : index
    %c0_111 = arith.constant 0 : index
    %101 = vector.load %arg2[%c32_110, %c0_111] : memref<36x16xf32, #tpu.memory_space<vmem>>, vector<4x16xf32>
    %cst_112 = arith.constant dense<0.000000e+00> : vector<128x16xf32>
    %102 = tpu.matmul %100, %101, %cst_112 {dimension_numbers = #tpu.dot_dimension_numbers<[1], [0], [0], [1], [0, 0, 1, 1], [], []>} : vector<128x4xf32>, vector<4x16xf32>, vector<128x16xf32> -> vector<128x16xf32>
    %103 = arith.addf %98, %102 : vector<128x16xf32>
    %104 = vector.broadcast %5 : vector<1x16xf32> to vector<128x16xf32>
    %105 = arith.addf %103, %104 : vector<128x16xf32>
    %106 = vector.shape_cast %105 : vector<128x16xf32> to vector<8x16x16xf32>
    %c0_113 = arith.constant 0 : index
    %c8_114 = arith.constant 8 : index
    %c0_115 = arith.constant 0 : index
    %c0_116 = arith.constant 0 : index
    %107 = vector.load %arg4[%c0_113, %c8_114, %c0_115, %c0_116] : memref<1x16x16x16xf32, #tpu.memory_space<vmem>>, vector<1x8x16x16xf32>
    %108 = vector.shape_cast %107 : vector<1x8x16x16xf32> to vector<8x16x16xf32>
    %109 = vector.shape_cast %106 : vector<8x16x16xf32> to vector<1x8x16x16xf32>
    tpu.vector_store %arg4[%c0_113, %c8_114, %c0_115, %c0_116], %109 {strides = array<i32>} : memref<1x16x16x16xf32, #tpu.memory_space<vmem>>, vector<1x8x16x16xf32>,
    return
  }
  func.func @transform_0(%arg0: i32) -> (i32, i32, i32, i32) {
    %c0_i32 = arith.constant 0 : i32
    %c0_i32_0 = arith.constant 0 : i32
    %c0_i32_1 = arith.constant 0 : i32
    %c0_i32_2 = arith.constant 0 : i32
    return %arg0, %c0_i32, %c0_i32_0, %c0_i32_1 : i32, i32, i32, i32
  }
  func.func @transform_1(%arg0: i32) -> (i32, i32) {
    %c0_i32 = arith.constant 0 : i32
    %c0_i32_0 = arith.constant 0 : i32
    %c0_i32_1 = arith.constant 0 : i32
    return %c0_i32, %c0_i32_0 : i32, i32
  }
  func.func @transform_2(%arg0: i32) -> (i32, i32) {
    %c0_i32 = arith.constant 0 : i32
    %c0_i32_0 = arith.constant 0 : i32
    %c0_i32_1 = arith.constant 0 : i32
    return %c0_i32, %c0_i32_0 : i32, i32
  }
  func.func @transform_3(%arg0: i32) -> (i32, i32, i32, i32) {
    %c0_i32 = arith.constant 0 : i32
    %c0_i32_0 = arith.constant 0 : i32
    %c0_i32_1 = arith.constant 0 : i32
    %c0_i32_2 = arith.constant 0 : i32
    return %arg0, %c0_i32, %c0_i32_0, %c0_i32_1 : i32, i32, i32, i32
  }
}

</mosaic_0001>

<bundles_post_ra>
// kernel: tpu_custom_call.1
= control target key start
LH: loop header
LB: loop body
LE: loop exit
PB: predicated region body
PF: predicated region fallthrough
CT: control target
= control target key end

     0   :  { %8 = vsyncpa [#allocation4], 0  ;;  %s4922_s0 = inlined_call_operand.vmem [shape: f32[2,16,16,4], index: 0, kind: input, shape index: {}]   ;;  %s4923_s1 = inlined_call_operand.vmem [shape: f32[36,16], index: 1, kind: input, shape index: {}]   ;;  %s4924_s2 = inlined_call_operand.vmem [shape: f32[1,16], index: 2, kind: input, shape index: {}]   ;;  %s4925_s3 = inlined_call_operand.hbm [shape: f32[2,16,16,16], index: 3, kind: output, shape index: {}]  }
   0x1   :  { %10 = vsyncpa [#allocation4 + $0x1], 0  ;;  %s3530_s12 = smov 0   ;;  %s3532_s13 = smov 0  }
   0x2   :  { %s3534_s14 = smov 0   ;;  %s3536_s15 = smov 0  }
   0x3 LB: > { %s3551_s16 = sadd.s32 4294967295, %s3505_s15   ;;  %s3061_s17 = sadd.s32 4294967294, %s3505_s15   ;;  %s3505_s15 = sphi %s3536_s15, %s4981_s15   ;;  %s3501_s14 = sphi %s3534_s14, %s4980_s14   ;;  %s3497_s13 = sphi %s3532_s13, %s4979_s13   ;;  %s3493_s12 = sphi %s3530_s12, %s4978_s12  }
   0x4   : > { %s3555_s18 = sadd.s32 1, %s3505_s15   ;;  %s91_s19 = sadd.s32 1, %s3501_s14 }
   0x5   : > { %s88_s20 = ssub.s32 %s3505_s15, %s3555_s18  ;;  %p101_p0 = scmp.ne.s32.totalorder %s3501_s14, %s3497_s13 }
   0x6   : > { %p89_p1 = scmp.eq.s32.totalorder %s88_s20, 0  ;;  %p102_p2 = scmp.eq.s32.totalorder %s3551_s16, 1 }
   0x7   : > { %p107_p3 = scmp.ne.s32.totalorder %s3497_s13, %s3493_s12  ;;  %p108_p4 = scmp.eq.s32.totalorder %s3061_s17, 1 }
   0x8   : > { %s3566_s21 = scalar_select %p89_p1, %s3501_s14, %s91_s19  }
   0x9   : > { %p3568_p5 = por %p102_p2, %p101_p0  ;;  %p3572_p6 = por %p108_p4, %p107_p3 }
   0xa   : > { %p3064_p7 = scmp.ge.s32.totalorder %s3505_s15, 1  ;;  %p140_p8 = scmp.lt.s32.totalorder %s3505_s15, 3 }
   0xc   : > { %p141_p9 = pnand %p3064_p7, %p140_p8 }
   0xe   : > { %144 = sbr.rel (%p141_p9) target bundleno = 783 (0x30f), region = 32 }
  0x13   : > { %v324_v0 = vld [vmem:[%s4923_s1 + $0x4] sm:$0xf]  ;;  %vm373_vm0 = vcmask 1043456   ;;  %v307_v1 = vld [vmem:[%s4923_s1] sm:$0xf]  ;;  %p164_p10 = scmp.lt.s32.totalorder %s3551_s16, 1 }
  0x14   : > { %3397 = vmatpush.msk.msra.mxu2 %vm373_vm0, %v324_v0  ;;  %3398 = vmatpush.msk.msra.mxu3 %vm373_vm0, %v307_v1  ;;  %vm169_vm1 = vcmask 31744   ;;  %v3507_v2 = vmov 0.0   ;;  %v574_v4 = vld [vmem:[%s4923_s1 + $0x8] sm:$0xf]  ;;  %v723_v5 = vld [vmem:[%s4923_s1 + $0xc] sm:$0xf] }
  0x15   : > { %s165_s28 = scalar_select %p164_p10, %s3551_s16, 1  ;;  %183 = vst.msk [vmem:[#allocation2 + $0x60] sm:$0xff] %vm169_vm1, %v3507_v2  ;;  %3068 = vmatpush.msk.msra.mxu0 %vm373_vm0, %v324_v0  ;;  %3085 = vmatpush.msk.msra.mxu1 %vm373_vm0, %v307_v1  ;;  %v872_v10 = vld [vmem:[%s4923_s1 + $0x10] sm:$0xf]  ;;  %v1021_v11 = vld [vmem:[%s4923_s1 + $0x14] sm:$0xf] }
  0x16   : > { %184 = vst.msk [vmem:[#allocation2 + $0x68] sm:$0xff] %vm169_vm1, %v3507_v2  ;;  %3102 = vmatpush.msk.msrb.mxu2 %vm373_vm0, %v574_v4  ;;  %3119 = vmatpush.msk.msrb.mxu3 %vm373_vm0, %v723_v5  ;;  %vm172_vm2 = vcmask 25600   ;;  %v1171_v41 = vld [vmem:[%s4923_s1 + $0x18] sm:$0xf]  ;;  %v1320_v42 = vld [vmem:[%s4923_s1 + $0x1c] sm:$0xf] }
  0x17   : > { %s3395_s29 = sshll.u32 %s165_s28, 8  ;;  %170 = vst.msk [vmem:[#allocation2] sm:$0xff] %vm169_vm1, %v3507_v2  ;;  %3136 = vmatpush.msk.msrb.mxu0 %vm373_vm0, %v872_v10  ;;  %3153 = vmatpush.msk.msrb.mxu1 %vm373_vm0, %v1021_v11  ;;  %v1469_v47 = vld [vmem:[%s4923_s1 + $0x20] sm:$0xf]  ;;  %v1672_v48 = vld [vmem:[%s4923_s1 + $0x4] sm:$0xf] }
  0x18   : > { %s3599_s5 = scalar_lea.vmem %s4922_s0, %s3395_s29  ;;  %171 = vst.msk [vmem:[#allocation2 + $0x8] sm:$0xff] %vm169_vm1, %v3507_v2  ;;  %s161_s30 = sand.u32 1, %s3497_s13   ;;  %vm1621_vm3 = vcmask 130048  }
  0x19   : > { %v231_v3 = vld [vmem:[%s3599_s5 + $0x30] sm:$0xff]  ;;  %174 = vst.msk [vmem:[#allocation2 + $0x18] sm:$0xff] %vm169_vm1, %v3507_v2  ;;  %v232_v13 = vld [vmem:[%s3599_s5 + $0x38] sm:$0xff]  ;;  %v233_v17 = vld [vmem:[%s3599_s5 + $0x40] sm:$0xff]  ;;  %s3065_s4 = sshll.u32 %s161_s30, 8  ;;  %s3396_s10 = sshll.u32 %s3551_s16, 8 }
  0x1a   : > { %264 = vst.msk [vmem:[#allocation2 + $0x61] sm:$0xff] %vm169_vm1, %v231_v3  ;;  %v234_v18 = vld [vmem:[%s3599_s5 + $0x48] sm:$0xff]  ;;  %v225_v19 = vld [vmem:[%s3599_s5] sm:$0xff]  ;;  %v235_v20 = vld [vmem:[%s3599_s5 + $0x50] sm:$0xff]  ;;  %s4389_s8 = scalar_lea.vmem [#allocation3], %s3065_s4  ;;  %s2995_s19 = scalar_lea.hbm %s4925_s3, %s3396_s10 }
  0x1b   : > { %175 = vst.msk [vmem:[#allocation2 + $0x20] sm:$0xff] %vm169_vm1, %v3507_v2  ;;  %v226_v21 = vld [vmem:[%s3599_s5 + $0x8] sm:$0xff]  ;;  %v236_v22 = vld [vmem:[%s3599_s5 + $0x58] sm:$0xff]  ;;  %v227_v23 = vld [vmem:[%s3599_s5 + $0x10] sm:$0xff]  ;;  %s2996_s16 = sshll.u32 %s4389_s8, 4  ;;  %s2998_s20 = sshll.u32 %s2995_s19, 4  ;;  %s2997_s16 = int_to_ptr.vmem [resolvable:$true] %s2996_s16  ;;  %s2999_s20 = int_to_ptr.hbm [resolvable:$true] %s2998_s20 }
  0x1c   : > { %177 = vst.msk [vmem:[#allocation2 + $0x30] sm:$0xff] %vm169_vm1, %v3507_v2  ;;  %v237_v24 = vld [vmem:[%s3599_s5 + $0x60] sm:$0xff]  ;;  %v228_v25 = vld [vmem:[%s3599_s5 + $0x18] sm:$0xff]  ;;  %v238_v28 = vld [vmem:[%s3599_s5 + $0x68] sm:$0xff]  ;;  %s2984_s24 = scalar_lea.sflag [#allocation4], %s161_s30  ;;  %s3457_s25 = sshra.s32 %s2999_s20, 4  ;;  %s3458_s25 = int_to_ptr.hbm [resolvable:$true] %s3457_s25 }
  0x1d   : > { %178 = vst.msk [vmem:[#allocation2 + $0x38] sm:$0xff] %vm169_vm1, %v3507_v2  ;;  %v229_v31 = vld [vmem:[%s3599_s5 + $0x20] sm:$0xff]  ;;  %v230_v36 = vld [vmem:[%s3599_s5 + $0x28] sm:$0xff]  ;;  %s3459_s26 = scalar_lea.hbm %s3458_s25, 256  ;;  %s3463_s29 = scalar_lea.hbm %s4925_s3, 512 }
  0x1e   : > { %180 = vst.msk [vmem:[#allocation2 + $0x48] sm:$0xff] %vm169_vm1, %v3507_v2  ;;  %v291_v9 = vld [vmem:[#allocation2] sm:$0xff]  ;;  %p3460_p11 = scmp.ne.s32.totalorder %s3458_s25, %s3459_s26  ;;  %p3464_p0 = scmp.lt.s32.totalorder %s3458_s25, %s4925_s3 }
  0x1f   : > { %181 = vst.msk [vmem:[#allocation2 + $0x50] sm:$0xff] %vm169_vm1, %v3507_v2  ;;  %v308_v8 = vld [vmem:[#allocation2 + $0x1] sm:$0xff]  ;;  %3086 = vmatmul.msk.f32.vlgmr.msra.gmra.mxu1 %vm169_vm1, %v291_v9  ;;  %p3465_p1 = scmp.lt.s32.totalorder %s3463_s29, %s3459_s26 }
  0x20   : > { %186 = vst.msk [vmem:[#allocation2 + $0x78] sm:$0xff] %vm169_vm1, %v3507_v2  ;;  %3069 = vmatmul.msk.f32.vlgmr.msra.gmra.mxu0 %vm169_vm1, %v308_v8  ;;  %v292_v12 = vld [vmem:[#allocation2 + $0x8] sm:$0xff]  ;;  %3221 = vmatpush.msk.msra.mxu1 %vm373_vm0, %v1672_v48  ;;  %p3461_p12 = pnand %p3460_p11, %p3568_p5 }
  0x21   : > { %v3627_v6 = vld [vmem:[#allocation2 + $0x61] sm:$0xff]  ;;  %187 = vst.msk [vmem:[#allocation2 + $0x80] sm:$0xff] %vm169_vm1, %v3507_v2  ;;  %3204 = vmatpush.msk.msra.mxu0 %vm373_vm0, %v1469_v47  ;;  %p3466_p2 = por %p3465_p1, %p3464_p0 }
  0x22   : > { %v3631_v7 = vld [vmem:[#allocation2 + $0x60] sm:$0xff]  ;;  %3077 = vmatmul.msk.f32.vlgmr.msra.gmra.mxu2 %vm169_vm1, %v3627_v6  ;;  %189 = vst.msk [vmem:[#allocation2 + $0x90] sm:$0xff] %vm169_vm1, %v3507_v2  ;;  %v1921_v47 = vld [vmem:[%s4923_s1 + $0x8] sm:$0xf]  ;;  %p3462_p13 = pneg %p3461_p12 }
  0x23   : > { %3094 = vmatmul.msk.f32.vlgmr.msra.gmra.mxu3 %vm169_vm1, %v3631_v7  ;;  %190 = vst.msk [vmem:[#allocation2 + $0x98] sm:$0xff] %vm169_vm1, %v3507_v2  ;;  %3170 = vmatpush.msk.msra.mxu2 %vm373_vm0, %v1171_v41  ;;  %v558_v57 = vld [vmem:[#allocation2 + $0x2] sm:$0xff] }
  0x24   : > { %192 = vst.msk [vmem:[#allocation2 + $0xa8] sm:$0xff] %vm169_vm1, %v3507_v2  ;;  %3187 = vmatpush.msk.msra.mxu3 %vm373_vm0, %v1320_v42  ;;  %v1655_v42 = vld [vmem:[%s4923_s1] sm:$0xf]  ;;  %p3467_p3 = pnand %p3466_p2, %p3462_p13 }
  0x25   : > { %193 = vst.msk [vmem:[#allocation2 + $0xb0] sm:$0xff] %vm169_vm1, %v3507_v2 }
  0x26   : > { %195 = vst.msk [vmem:[#allocation2 + $0xc0] sm:$0xff] %vm169_vm1, %v3507_v2 }
  0x27   : > { %196 = vst.msk [vmem:[#allocation2 + $0xc8] sm:$0xff] %vm169_vm1, %v3507_v2  ;;  %3087 = vmatmul.msk.f32.gmra.mxu1 %vm169_vm1, %v292_v12 }
  0x28   : > { %198 = vst.msk [vmem:[#allocation2 + $0xd8] sm:$0xff] %vm169_vm1, %v3507_v2 }
  0x29   : > { %199 = vst.msk [vmem:[#allocation2 + $0xe0] sm:$0xff] %vm169_vm1, %v3507_v2 }
  0x2a   : > { %201 = vst.msk [vmem:[#allocation2 + $0xf0] sm:$0xff] %vm169_vm1, %v3507_v2 }
  0x2b   : > { %202 = vst.msk [vmem:[#allocation2 + $0xf8] sm:$0xff] %vm169_vm1, %v3507_v2 }
  0x2c   : > { %204 = vst.msk [vmem:[#allocation2 + $0x108] sm:$0xff] %vm169_vm1, %v3507_v2 }
  0x2d   : > { %205 = vst.msk [vmem:[#allocation2 + $0x110] sm:$0xff] %vm169_vm1, %v3507_v2 }
  0x2e   : > { %207 = vst.msk [vmem:[#allocation2 + $0x120] sm:$0xff] %vm169_vm1, %v3507_v2 }
  0x2f   : > { %208 = vst.msk [vmem:[#allocation2 + $0x128] sm:$0xff] %vm169_vm1, %v3507_v2 }
  0x30   : > { %210 = vst.msk [vmem:[#allocation2 + $0x138] sm:$0xff] %vm169_vm1, %v3507_v2 }
  0x31   : > { %211 = vst.msk [vmem:[#allocation2 + $0x140] sm:$0xff] %vm169_vm1, %v3507_v2 }
  0x32   : > { %213 = vst.msk [vmem:[#allocation2 + $0x150] sm:$0xff] %vm169_vm1, %v3507_v2 }
  0x33   : > { %214 = vst.msk [vmem:[#allocation2 + $0x158] sm:$0xff] %vm169_vm1, %v3507_v2 }
  0x34   : > { %216 = vst.msk [vmem:[#allocation2 + $0x168] sm:$0xff] %vm169_vm1, %v3507_v2 }
  0x35   : > { %217 = vst.msk [vmem:[#allocation2 + $0x170] sm:$0xff] %vm169_vm1, %v3507_v2 }
  0x36   : > { %219 = vst.msk [vmem:[#allocation2 + $0x180] sm:$0xff] %vm169_vm1, %v3507_v2 }
  0x37   : > { %220 = vst.msk [vmem:[#allocation2 + $0x188] sm:$0xff] %vm169_vm1, %v3507_v2 }
  0x38   : > { %222 = vst.msk [vmem:[#allocation2 + $0x198] sm:$0xff] %vm169_vm1, %v3507_v2 }
  0x39   : > { %223 = vst.msk [vmem:[#allocation2 + $0x1a0] sm:$0xff] %vm169_vm1, %v3507_v2 }
  0x3a   : > { %185 = vst.msk [vmem:[#allocation2 + $0x70] sm:$0x3] %vm172_vm2, %v3507_v2 }
  0x3b   : > { %265 = vst.msk [vmem:[#allocation2 + $0x69] sm:$0xff] %vm169_vm1, %v232_v13 }
  0x3c   : > { %173 = vst.msk [vmem:[#allocation2 + $0x10] sm:$0x3] %vm172_vm2, %v3507_v2 }
  0x3d   : > { %176 = vst.msk [vmem:[#allocation2 + $0x28] sm:$0x3] %vm172_vm2, %v3507_v2 }
  0x3e   : > { %179 = vst.msk [vmem:[#allocation2 + $0x40] sm:$0x3] %vm172_vm2, %v3507_v2 }
  0x3f   : > { %182 = vst.msk [vmem:[#allocation2 + $0x58] sm:$0x3] %vm172_vm2, %v3507_v2 }
  0x40   : > { %188 = vst.msk [vmem:[#allocation2 + $0x88] sm:$0x3] %vm172_vm2, %v3507_v2 }
  0x41   : > { %191 = vst.msk [vmem:[#allocation2 + $0xa0] sm:$0x3] %vm172_vm2, %v3507_v2 }
  0x42   : > { %v3712_v14 = vld [vmem:[#allocation2 + $0x69] sm:$0xff]  ;;  %194 = vst.msk [vmem:[#allocation2 + $0xb8] sm:$0x3] %vm172_vm2, %v3507_v2 }
  0x43   : > { %v3716_v15 = vld [vmem:[#allocation2 + $0x68] sm:$0xff]  ;;  %3078 = vmatmul.msk.f32.gmra.mxu2 %vm169_vm1, %v3712_v14  ;;  %197 = vst.msk [vmem:[#allocation2 + $0xd0] sm:$0x3] %vm172_vm2, %v3507_v2 }
  0x44   : > { %3095 = vmatmul.msk.f32.gmra.mxu3 %vm169_vm1, %v3716_v15  ;;  %v309_v16 = vld [vmem:[#allocation2 + $0x9] sm:$0xff]  ;;  %200 = vst.msk [vmem:[#allocation2 + $0xe8] sm:$0x3] %vm172_vm2, %v3507_v2 }
  0x45   : > { %3070 = vmatmul.msk.f32.gmra.mxu0 %vm169_vm1, %v309_v16  ;;  %203 = vst.msk [vmem:[#allocation2 + $0x100] sm:$0x3] %vm172_vm2, %v3507_v2  ;;  %v559_v59 = vld [vmem:[#allocation2 + $0xa] sm:$0xff]  ;;  %v3913_v1 = vld [vmem:[#allocation2 + $0x62] sm:$0xff] }
  0x46   : > { %206 = vst.msk [vmem:[#allocation2 + $0x118] sm:$0x3] %vm172_vm2, %v3507_v2 }
  0x47   : > { %209 = vst.msk [vmem:[#allocation2 + $0x130] sm:$0x3] %vm172_vm2, %v3507_v2 }
  0x48   : > { %212 = vst.msk [vmem:[#allocation2 + $0x148] sm:$0x3] %vm172_vm2, %v3507_v2 }
  0x49   : > { %215 = vst.msk [vmem:[#allocation2 + $0x160] sm:$0x3] %vm172_vm2, %v3507_v2 }
  0x4a   : > { %218 = vst.msk [vmem:[#allocation2 + $0x178] sm:$0x3] %vm172_vm2, %v3507_v2 }
  0x4b   : > { %221 = vst.msk [vmem:[#allocation2 + $0x190] sm:$0x3] %vm172_vm2, %v3507_v2 }
  0x4c   : > { %224 = vst.msk [vmem:[#allocation2 + $0x1a8] sm:$0x3] %vm172_vm2, %v3507_v2  ;;  %v3923_v2 = vld [vmem:[#allocation2 + $0x6a] sm:$0xff] }
  0x4d   : > { %266 = vst.msk [vmem:[#allocation2 + $0x79] sm:$0xff] %vm169_vm1, %v233_v17  ;;  %v239_v17 = vld [vmem:[%s3599_s5 + $0x70] sm:$0xff] }
  0x4e   : > { %267 = vst.msk [vmem:[#allocation2 + $0x81] sm:$0xff] %vm169_vm1, %v234_v18 }
  0x4f   : > { %258 = vst.msk [vmem:[#allocation2 + $0x19] sm:$0xff] %vm169_vm1, %v225_v19 }
  0x50   : > { %268 = vst.msk [vmem:[#allocation2 + $0x91] sm:$0xff] %vm169_vm1, %v235_v20 }
  0x51   : > { %259 = vst.msk [vmem:[#allocation2 + $0x21] sm:$0xff] %vm169_vm1, %v226_v21  ;;  %v240_v21 = vld [vmem:[%s3599_s5 + $0x78] sm:$0xff] }
  0x52   : > { %269 = vst.msk [vmem:[#allocation2 + $0x99] sm:$0xff] %vm169_vm1, %v236_v22 }
  0x53   : > { %260 = vst.msk [vmem:[#allocation2 + $0x31] sm:$0xff] %vm169_vm1, %v227_v23 }
  0x54   : > { %v3759_v26 = vld [vmem:[#allocation2 + $0x79] sm:$0xff]  ;;  %270 = vst.msk [vmem:[#allocation2 + $0xa9] sm:$0xff] %vm169_vm1, %v237_v24 }
  0x55   : > { %v3761_v27 = vld [vmem:[#allocation2 + $0x78] sm:$0xff]  ;;  %3079 = vmatmul.msk.f32.gmra.mxu2 %vm169_vm1, %v3759_v26  ;;  %261 = vst.msk [vmem:[#allocation2 + $0x39] sm:$0xff] %vm169_vm1, %v228_v25  ;;  %v3775_v32 = vld [vmem:[#allocation2 + $0x81] sm:$0xff] }
  0x56   : > { %3096 = vmatmul.msk.f32.gmra.mxu3 %vm169_vm1, %v3761_v27  ;;  %v310_v29 = vld [vmem:[#allocation2 + $0x19] sm:$0xff]  ;;  %271 = vst.msk [vmem:[#allocation2 + $0xb1] sm:$0xff] %vm169_vm1, %v238_v28  ;;  %v3955_v12 = vld [vmem:[#allocation2 + $0x82] sm:$0xff] }
  0x57   : > { %v293_v30 = vld [vmem:[#allocation2 + $0x18] sm:$0xff]  ;;  %3071 = vmatmul.msk.f32.gmra.mxu0 %vm169_vm1, %v310_v29  ;;  %262 = vst.msk [vmem:[#allocation2 + $0x49] sm:$0xff] %vm169_vm1, %v229_v31  ;;  %v3777_v33 = vld [vmem:[#allocation2 + $0x80] sm:$0xff]  ;;  %v3789_v38 = vld [vmem:[#allocation2 + $0x90] sm:$0xff] }
  0x58   : > { %3088 = vmatmul.msk.f32.gmra.mxu1 %vm169_vm1, %v293_v30  ;;  %v311_v34 = vld [vmem:[#allocation2 + $0x21] sm:$0xff]  ;;  %263 = vst.msk [vmem:[#allocation2 + $0x51] sm:$0xff] %vm169_vm1, %v230_v36  ;;  %v3787_v37 = vld [vmem:[#allocation2 + $0x91] sm:$0xff] }
  0x59   : > { %v294_v35 = vld [vmem:[#allocation2 + $0x20] sm:$0xff]  ;;  %v3813_v44 = vld [vmem:[#allocation2 + $0x98] sm:$0xff]  ;;  %272 = vst.msk [vmem:[#allocation2 + $0xc1] sm:$0xff] %vm169_vm1, %v239_v17 }
  0x5a   : > { %v3791_v39 = vld [vmem:[#allocation2 + $0x31] sm:$0xff]  ;;  %v3811_v43 = vld [vmem:[#allocation2 + $0x99] sm:$0xff]  ;;  %v1006_v60 = vld [vmem:[#allocation2 + $0x22] sm:$0xff]  ;;  %273 = vst.msk [vmem:[#allocation2 + $0xc9] sm:$0xff] %vm169_vm1, %v240_v21 }
  0x5b   : > { %v3793_v40 = vld [vmem:[#allocation2 + $0x30] sm:$0xff]  ;;  %v3837_v50 = vld [vmem:[#allocation2 + $0xa8] sm:$0xff]  ;;  %v1005_v58 = vld [vmem:[#allocation2 + $0x1a] sm:$0xff] }
  0x5c   : > { %v3815_v45 = vld [vmem:[#allocation2 + $0x39] sm:$0xff]  ;;  %v3835_v49 = vld [vmem:[#allocation2 + $0xa9] sm:$0xff] }
  0x5d   : > { %3080 = vmatmul.msk.f32.gmra.mxu2 %vm169_vm1, %v3775_v32  ;;  %v3817_v46 = vld [vmem:[#allocation2 + $0x38] sm:$0xff]  ;;  %v3853_v54 = vld [vmem:[#allocation2 + $0xb0] sm:$0xff]  ;;  %v2071_v21 = vld [vmem:[%s4923_s1 + $0xc] sm:$0xf] }
  0x5e   : > { %3097 = vmatmul.msk.f32.gmra.mxu3 %vm169_vm1, %v3777_v33  ;;  %v3839_v51 = vld [vmem:[#allocation2 + $0x49] sm:$0xff]  ;;  %v3851_v53 = vld [vmem:[#allocation2 + $0xb1] sm:$0xff]  ;;  %4941 = vst [vmem:[#allocation7_spill] sm:$0xff] %v3853_v54  ;;  %v3884_v62 = vld [vmem:[#allocation2 + $0x3a] sm:$0xff] }
  0x5f   : > { %3072 = vmatmul.msk.f32.gmra.mxu0 %vm169_vm1, %v311_v34  ;;  %v3841_v52 = vld [vmem:[#allocation2 + $0x48] sm:$0xff]  ;;  %4940 = vst [vmem:[#allocation6_spill] sm:$0xff] %v3851_v53  ;;  %v3855_v55 = vld [vmem:[#allocation2 + $0x51] sm:$0xff]  ;;  %v3941_v9 = vld [vmem:[#allocation2 + $0x7a] sm:$0xff] }
  0x60   : > { %3089 = vmatmul.msk.f32.gmra.mxu1 %vm169_vm1, %v294_v35  ;;  %v3857_v56 = vld [vmem:[#allocation2 + $0x50] sm:$0xff] }
  0x61   : > { %v3875_v61 = vld [vmem:[#allocation2 + $0x32] sm:$0xff]  ;;  %v3893_v63 = vld [vmem:[#allocation2 + $0x4a] sm:$0xff] }
  0x62   : > { %v3903_v0 = vld [vmem:[#allocation2 + $0x52] sm:$0xff]  ;;  %v4009_v41 = vld [vmem:[#allocation2 + $0xaa] sm:$0xff] }
  0x63   : > { %v3975_v20 = vld [vmem:[#allocation2 + $0x92] sm:$0xff] }
  0x64   : > { %v4033_v17 = vld [vmem:[#allocation2 + $0xb2] sm:$0xff] }
  0x65   : > { %3081 = vmatmul.msk.f32.gmra.mxu2 %vm169_vm1, %v3787_v37  ;;  %4945 = vst [vmem:[#allocation11_spill] sm:$0xff] %v4033_v17 }
  0x66   : > { %3098 = vmatmul.msk.f32.gmra.mxu3 %vm169_vm1, %v3789_v38 }
  0x67   : > { %3073 = vmatmul.msk.f32.gmra.mxu0 %vm169_vm1, %v3791_v39 }
  0x68   : > { %3090 = vmatmul.msk.f32.gmra.mxu1 %vm169_vm1, %v3793_v40 }
  0x6d   : > { %3082 = vmatmul.msk.f32.gmra.mxu2 %vm169_vm1, %v3811_v43 }
  0x6e   : > { %3099 = vmatmul.msk.f32.gmra.mxu3 %vm169_vm1, %v3813_v44 }
  0x6f   : > { %3074 = vmatmul.msk.f32.gmra.mxu0 %vm169_vm1, %v3815_v45 }
  0x70   : > { %3091 = vmatmul.msk.f32.gmra.mxu1 %vm169_vm1, %v3817_v46 }
  0x75   : > { %3083 = vmatmul.msk.f32.gmra.mxu2 %vm169_vm1, %v3835_v49 }
  0x76   : > { %3100 = vmatmul.msk.f32.gmra.mxu3 %vm169_vm1, %v3837_v50 }
  0x77   : > { %3075 = vmatmul.msk.f32.gmra.mxu0 %vm169_vm1, %v3839_v51 }
  0x78   : > { %3092 = vmatmul.msk.f32.gmra.mxu1 %vm169_vm1, %v3841_v52 }
  0x7d   : > { %3084 = vmatmul.msk.f32.gmra.mxu2 %vm169_vm1, %v3851_v53 }
  0x7e   : > { %3101 = vmatmul.msk.f32.gmra.mxu3 %vm169_vm1, %v3853_v54 }
  0x7f   : > { %3076 = vmatmul.msk.f32.gmra.mxu0 %vm169_vm1, %v3855_v55 }
  0x80   : > { %3093 = vmatmul.msk.f32.gmra.mxu1 %vm169_vm1, %v3857_v56 }
  0x85   : > { %3103 = vmatmul.msk.f32.vlgmr.msrb.gmra.mxu2 %vm169_vm1, %v558_v57 }
  0x86   : > { %3120 = vmatmul.msk.f32.vlgmr.msrb.gmra.mxu3 %vm169_vm1, %v293_v30  ;;  %3238 = vmatpush.msk.msrb.mxu2 %vm373_vm0, %v1655_v42  ;;  %v4052_v42 = vld [vmem:[#allocation2 + $0xc0] sm:$0xff] }
  0x87   : > { %3137 = vmatmul.msk.f32.vlgmr.msrb.gmra.mxu0 %vm169_vm1, %v310_v29  ;;  %v3993_v29 = vld [vmem:[#allocation2 + $0x9a] sm:$0xff]  ;;  %3255 = vmatpush.msk.msrb.mxu3 %vm373_vm0, %v1921_v47  ;;  %4947 = vst [vmem:[#allocation13_spill] sm:$0xff] %v4052_v42 }
  0x88   : > { %3154 = vmatmul.msk.f32.vlgmr.msrb.gmra.mxu1 %vm169_vm1, %v1005_v58  ;;  %3272 = vmatpush.msk.msrb.mxu0 %vm373_vm0, %v2071_v21 }
  0x8d   : > { %3104 = vmatmul.msk.f32.gmra.mxu2 %vm169_vm1, %v559_v59 }
  0x8e   : > { %3121 = vmatmul.msk.f32.gmra.mxu3 %vm169_vm1, %v294_v35 }
  0x8f   : > { %3138 = vmatmul.msk.f32.gmra.mxu0 %vm169_vm1, %v311_v34 }
  0x90   : > { %3155 = vmatmul.msk.f32.gmra.mxu1 %vm169_vm1, %v1006_v60 }
  0x95   : > { %3105 = vmatmul.msk.f32.gmra.mxu2 %vm169_vm1, %v1005_v58 }
  0x96   : > { %3122 = vmatmul.msk.f32.gmra.mxu3 %vm169_vm1, %v3793_v40 }
  0x97   : > { %3139 = vmatmul.msk.f32.gmra.mxu0 %vm169_vm1, %v3791_v39 }
  0x98   : > { %3156 = vmatmul.msk.f32.gmra.mxu1 %vm169_vm1, %v3875_v61 }
  0x9c   : > { %v3935_v4 = vpop.f32.mrf.mxu1 }
  0x9d   : > { %3106 = vmatmul.msk.f32.gmra.mxu2 %vm169_vm1, %v1006_v60  ;;  %v3933_v3 = vpop.f32.mrf.mxu0 }
  0x9e   : > { %3123 = vmatmul.msk.f32.gmra.mxu3 %vm169_vm1, %v3817_v46 }
  0x9f   : > { %3140 = vmatmul.msk.f32.gmra.mxu0 %vm169_vm1, %v3815_v45 }
  0xa0   : > { %3157 = vmatmul.msk.f32.gmra.mxu1 %vm169_vm1, %v3884_v62 }
  0xa4   : > { %v3953_v11 = vpop.f32.mrf.mxu1 }
  0xa5   : > { %3107 = vmatmul.msk.f32.gmra.mxu2 %vm169_vm1, %v3875_v61  ;;  %v3937_v5 = vpop.f32.mrf.mxu2 }
  0xa6   : > { %3124 = vmatmul.msk.f32.gmra.mxu3 %vm169_vm1, %v3841_v52  ;;  %v3939_v8 = vpop.f32.mrf.mxu3 }
  0xa7   : > { %3141 = vmatmul.msk.f32.gmra.mxu0 %vm169_vm1, %v3839_v51 }
  0xa8   : > { %3158 = vmatmul.msk.f32.gmra.mxu1 %vm169_vm1, %v3893_v63 }
  0xad   : > { %3108 = vmatmul.msk.f32.gmra.mxu2 %vm169_vm1, %v3884_v62 }
  0xae   : > { %3125 = vmatmul.msk.f32.gmra.mxu3 %vm169_vm1, %v3857_v56 }
  0xaf   : > { %3142 = vmatmul.msk.f32.gmra.mxu0 %vm169_vm1, %v3855_v55 }
  0xb0   : > { %3159 = vmatmul.msk.f32.gmra.mxu1 %vm169_vm1, %v3903_v0 }
  0xb5   : > { %3109 = vmatmul.msk.f32.gmra.mxu2 %vm169_vm1, %v3893_v63 }
  0xb6   : > { %3126 = vmatmul.msk.f32.gmra.mxu3 %vm169_vm1, %v3631_v7 }
  0xb7   : > { %3143 = vmatmul.msk.f32.gmra.mxu0 %vm169_vm1, %v3627_v6 }
  0xb8   : > { %3160 = vmatmul.msk.f32.gmra.mxu1 %vm169_vm1, %v3913_v1 }
  0xbd   : > { %3110 = vmatmul.msk.f32.gmra.mxu2 %vm169_vm1, %v3903_v0 }
  0xbe   : > { %3127 = vmatmul.msk.f32.gmra.mxu3 %vm169_vm1, %v3716_v15 }
  0xbf   : > { %3144 = vmatmul.msk.f32.gmra.mxu0 %vm169_vm1, %v3712_v14 }
  0xc0   : > { %3161 = vmatmul.msk.f32.gmra.mxu1 %vm169_vm1, %v3923_v2 }
  0xc2   : > { %v3951_v10 = vpop.f32.mrf.mxu0 }
  0xc5   : > { %3111 = vmatmul.msk.f32.gmra.mxu2 %vm169_vm1, %v3913_v1 }
  0xc6   : > { %3128 = vmatmul.msk.f32.gmra.mxu3 %vm169_vm1, %v3761_v27  ;;  %v3961_v13 = vpop.f32.mrf.mxu2 }
  0xc7   : > { %3145 = vmatmul.msk.f32.gmra.mxu0 %vm169_vm1, %v3759_v26  ;;  %v3963_v16 = vpop.f32.mrf.mxu3 }
  0xc8   : > { %3162 = vmatmul.msk.f32.gmra.mxu1 %vm169_vm1, %v3941_v9 }
  0xcd   : > { %3112 = vmatmul.msk.f32.gmra.mxu2 %vm169_vm1, %v3923_v2 }
  0xce   : > { %3129 = vmatmul.msk.f32.gmra.mxu3 %vm169_vm1, %v3777_v33 }
  0xcf   : > { %3146 = vmatmul.msk.f32.gmra.mxu0 %vm169_vm1, %v3775_v32 }
  0xd0   : > { %3163 = vmatmul.msk.f32.gmra.mxu1 %vm169_vm1, %v3955_v12 }
  0xd4   : > { %v3971_v18 = vpop.f32.mrf.mxu0 }
  0xd5   : > { %v3973_v19 = vpop.f32.mrf.mxu1  ;;  %3113 = vmatmul.msk.f32.gmra.mxu2 %vm169_vm1, %v3941_v9 }
  0xd6   : > { %3130 = vmatmul.msk.f32.gmra.mxu3 %vm169_vm1, %v3789_v38 }
  0xd7   : > { %3147 = vmatmul.msk.f32.gmra.mxu0 %vm169_vm1, %v3787_v37 }
  0xd8   : > { %3164 = vmatmul.msk.f32.gmra.mxu1 %vm169_vm1, %v3975_v20  ;;  %v424_v22 = vpop.f32.mrf.mxu2 }
  0xd9   : > { %v540_v23 = vpop.f32.mrf.mxu3 }
  0xda   : > { %v3987_v24 = vadd.f32 %v540_v23, %v424_v22 }
  0xdc   : > { %4942 = vst [vmem:[#allocation8_spill] sm:$0xff] %v3987_v24  ;;  %v3989_v25 = vpop.f32.mrf.mxu0 }
  0xdd   : > { %v3991_v28 = vpop.f32.mrf.mxu1  ;;  %3114 = vmatmul.msk.f32.gmra.mxu2 %vm169_vm1, %v3955_v12 }
  0xde   : > { %3131 = vmatmul.msk.f32.gmra.mxu3 %vm169_vm1, %v3813_v44 }
  0xdf   : > { %3148 = vmatmul.msk.f32.gmra.mxu0 %vm169_vm1, %v3811_v43 }
  0xe0   : > { %3165 = vmatmul.msk.f32.gmra.mxu1 %vm169_vm1, %v3993_v29  ;;  %v427_v30 = vpop.f32.mrf.mxu2 }
  0xe1   : > { %v543_v31 = vpop.f32.mrf.mxu3 }
  0xe2   : > { %v4003_v34 = vadd.f32 %v543_v31, %v427_v30  ;;  %v2220_v31 = vld [vmem:[%s4923_s1 + $0x10] sm:$0xf] }
  0xe3   : > { %3289 = vmatpush.msk.msrb.mxu1 %vm373_vm0, %v2220_v31 }
  0xe4   : > { %4943 = vst [vmem:[#allocation9_spill] sm:$0xff] %v4003_v34  ;;  %v4005_v35 = vpop.f32.mrf.mxu0 }
  0xe5   : > { %v4007_v36 = vpop.f32.mrf.mxu1  ;;  %3115 = vmatmul.msk.f32.gmra.mxu2 %vm169_vm1, %v3975_v20 }
  0xe6   : > { %3132 = vmatmul.msk.f32.gmra.mxu3 %vm169_vm1, %v3837_v50 }
  0xe7   : > { %3149 = vmatmul.msk.f32.gmra.mxu0 %vm169_vm1, %v3835_v49 }
  0xe8   : > { %3166 = vmatmul.msk.f32.gmra.mxu1 %vm169_vm1, %v4009_v41  ;;  %v430_v48 = vpop.f32.mrf.mxu2 }
  0xe9   : > { %v546_v57 = vpop.f32.mrf.mxu3 }
  0xea   : > { %v4027_v58 = vadd.f32 %v546_v57, %v430_v48  ;;  %v4059_v57 = vld [vmem:[#allocation2 + $0xc1] sm:$0xff] }
  0xec   : > { %4944 = vst [vmem:[#allocation10_spill] sm:$0xff] %v4027_v58  ;;  %v4029_v59 = vpop.f32.mrf.mxu0  ;;  %v4061_v58 = vld [vmem:[#allocation2 + $0xc2] sm:$0xff] }
  0xed   : > { %v4031_v60 = vpop.f32.mrf.mxu1  ;;  %3116 = vmatmul.msk.f32.gmra.mxu2 %vm169_vm1, %v3993_v29  ;;  %4948 = vst [vmem:[#allocation14_spill] sm:$0xff] %v4061_v58 }
  0xee   : > { %3133 = vmatmul.msk.f32.gmra.mxu3 %vm169_vm1, %v3853_v54  ;;  %v4083_v54 = vld [vmem:[#allocation2 + $0xca] sm:$0xff] }
  0xef   : > { %3150 = vmatmul.msk.f32.gmra.mxu0 %vm169_vm1, %v3851_v53  ;;  %4951 = vst [vmem:[#allocation17_spill] sm:$0xff] %v4083_v54 }
  0xf0   : > { %3167 = vmatmul.msk.f32.gmra.mxu1 %vm169_vm1, %v4033_v17  ;;  %v433_v22 = vpop.f32.mrf.mxu2 }
  0xf1   : > { %v549_v23 = vpop.f32.mrf.mxu3 }
  0xf2   : > { %v4047_v30 = vadd.f32 %v549_v23, %v433_v22  ;;  %v241_v23 = vld [vmem:[%s3599_s5 + $0x80] sm:$0xff] }
  0xf3   : > { %274 = vst.msk [vmem:[#allocation2 + $0xd9] sm:$0xff] %vm169_vm1, %v241_v23  ;;  %v242_v23 = vld [vmem:[%s3599_s5 + $0x88] sm:$0xff] }
  0xf4   : > { %4946 = vst [vmem:[#allocation12_spill] sm:$0xff] %v4047_v30  ;;  %v4055_v47 = vpop.f32.mrf.mxu0  ;;  %v4075_v30 = vld [vmem:[#allocation2 + $0xc8] sm:$0xff] }
  0xf5   : > { %v4057_v48 = vpop.f32.mrf.mxu1  ;;  %3117 = vmatmul.msk.f32.gmra.mxu2 %vm169_vm1, %v4009_v41  ;;  %4950 = vst [vmem:[#allocation16_spill] sm:$0xff] %v4075_v30 }
  0xf6   : > { %3134 = vmatmul.msk.f32.gmra.mxu3 %vm169_vm1, %v4052_v42  ;;  %v4081_v42 = vld [vmem:[#allocation2 + $0xc9] sm:$0xff]  ;;  %275 = vst.msk [vmem:[#allocation2 + $0xe1] sm:$0xff] %vm169_vm1, %v242_v23 }
  0xf7   : > { %3151 = vmatmul.msk.f32.gmra.mxu0 %vm169_vm1, %v4059_v57  ;;  %v243_v23 = vld [vmem:[%s3599_s5 + $0x90] sm:$0xff] }
  0xf8   : > { %3168 = vmatmul.msk.f32.gmra.mxu1 %vm169_vm1, %v4061_v58  ;;  %v436_v21 = vpop.f32.mrf.mxu2  ;;  %276 = vst.msk [vmem:[#allocation2 + $0xf1] sm:$0xff] %vm169_vm1, %v243_v23 }
  0xf9   : > { %v552_v22 = vpop.f32.mrf.mxu3 }
  0xfa   : > { %v4072_v31 = vadd.f32 %v552_v22, %v436_v21 }
  0xfc   : > { %4949 = vst [vmem:[#allocation15_spill] sm:$0xff] %v4072_v31  ;;  %v4077_v34 = vpop.f32.mrf.mxu0 }
  0xfd   : > { %v4079_v53 = vpop.f32.mrf.mxu1  ;;  %3118 = vmatmul.msk.f32.gmra.mxu2 %vm169_vm1, %v4033_v17 }
  0xfe   : > { %3135 = vmatmul.msk.f32.gmra.mxu3 %vm169_vm1, %v4075_v30  ;;  %v511_v30 = vadd.f32 %v3935_v4, %v3933_v3 }
  0xff   : > { %3152 = vmatmul.msk.f32.gmra.mxu0 %vm169_vm1, %v4081_v42 }
 0x100   : > { %3169 = vmatmul.msk.f32.gmra.mxu1 %vm169_vm1, %v4083_v54  ;;  %v439_v21 = vpop.f32.mrf.mxu2 }
 0x101   : > { %v555_v22 = vpop.f32.mrf.mxu3 }
 0x102   : > { %v4094_v31 = vadd.f32 %v555_v22, %v439_v21 }
 0x104   : > { %4952 = vst [vmem:[#allocation18_spill] sm:$0xff] %v4094_v31  ;;  %v941_v58 = vpop.f32.mrf.mxu0 }
 0x105   : > { %v1090_v24 = vpop.f32.mrf.mxu1  ;;  %3171 = vmatmul.msk.f32.vlgmr.msra.gmra.mxu2 %vm169_vm1, %v3793_v40 }
 0x106   : > { %3188 = vmatmul.msk.f32.vlgmr.msra.gmra.mxu3 %vm169_vm1, %v3791_v39 }
 0x107   : > { %3205 = vmatmul.msk.f32.vlgmr.msra.gmra.mxu0 %vm169_vm1, %v3875_v61  ;;  %v514_v61 = vadd.f32 %v3953_v11, %v3951_v10 }
 0x108   : > { %3222 = vmatmul.msk.f32.vlgmr.msra.gmra.mxu1 %vm169_vm1, %v4059_v57  ;;  %v643_v21 = vpop.f32.mrf.mxu2 }
 0x109   : > { %v792_v22 = vpop.f32.mrf.mxu3  ;;  %v691_v31 = vadd.f32 %v643_v21, %v511_v30 }
 0x10b   : > { %v840_v40 = vadd.f32 %v792_v22, %v691_v31  ;;  %v4123_v22 = vld [vmem:[#allocation2 + $0xd9] sm:$0xff] }
 0x10c   : > { %v944_v54 = vpop.f32.mrf.mxu0 }
 0x10d   : > { %v1093_v17 = vpop.f32.mrf.mxu1  ;;  %v989_v39 = vadd.f32 %v941_v58, %v840_v40  ;;  %3172 = vmatmul.msk.f32.gmra.mxu2 %vm169_vm1, %v3817_v46  ;;  %v244_v58 = vld [vmem:[%s3599_s5 + $0x98] sm:$0xff] }
 0x10e   : > { %3189 = vmatmul.msk.f32.gmra.mxu3 %vm169_vm1, %v3815_v45  ;;  %277 = vst.msk [vmem:[#allocation2 + $0xf9] sm:$0xff] %vm169_vm1, %v244_v58 }
 0x10f   : > { %v4115_v3 = vadd.f32 %v1090_v24, %v989_v39  ;;  %3206 = vmatmul.msk.f32.gmra.mxu0 %vm169_vm1, %v3884_v62  ;;  %v517_v62 = vadd.f32 %v3973_v19, %v3971_v18 }
 0x110   : > { %3223 = vmatmul.msk.f32.gmra.mxu1 %vm169_vm1, %v4081_v42  ;;  %v646_v4 = vpop.f32.mrf.mxu2 }
 0x111   : > { %v795_v30 = vpop.f32.mrf.mxu3  ;;  %v692_v31 = vadd.f32 %v646_v4, %v514_v61  ;;  %v4139_v61 = vld [vmem:[#allocation2 + $0xe1] sm:$0xff] }
 0x113   : > { %v841_v46 = vadd.f32 %v795_v30, %v692_v31  ;;  %v246_v30 = vld [vmem:[%s3599_s5 + $0xa8] sm:$0xff] }
 0x114   : > { %v947_v45 = vpop.f32.mrf.mxu0  ;;  %279 = vst.msk [vmem:[#allocation2 + $0x111] sm:$0xff] %vm169_vm1, %v246_v30 }
 0x115   : > { %v1096_v21 = vpop.f32.mrf.mxu1  ;;  %v990_v10 = vadd.f32 %v944_v54, %v841_v46  ;;  %3173 = vmatmul.msk.f32.gmra.mxu2 %vm169_vm1, %v3841_v52  ;;  %v245_v54 = vld [vmem:[%s3599_s5 + $0xa0] sm:$0xff]  ;;  %v4155_v46 = vld [vmem:[#allocation2 + $0xf1] sm:$0xff] }
 0x116   : > { %3190 = vmatmul.msk.f32.gmra.mxu3 %vm169_vm1, %v3839_v51  ;;  %278 = vst.msk [vmem:[#allocation2 + $0x109] sm:$0xff] %vm169_vm1, %v245_v54 }
 0x117   : > { %v4131_v11 = vadd.f32 %v1093_v17, %v990_v10  ;;  %3207 = vmatmul.msk.f32.gmra.mxu0 %vm169_vm1, %v3893_v63  ;;  %v520_v63 = vadd.f32 %v3991_v28, %v3989_v25  ;;  %v247_v10 = vld [vmem:[%s3599_s5 + $0xb0] sm:$0xff] }
 0x118   : > { %3224 = vmatmul.msk.f32.gmra.mxu1 %vm169_vm1, %v4123_v22  ;;  %v649_v24 = vpop.f32.mrf.mxu2  ;;  %280 = vst.msk [vmem:[#allocation2 + $0x121] sm:$0xff] %vm169_vm1, %v247_v10 }
 0x119   : > { %v798_v23 = vpop.f32.mrf.mxu3  ;;  %v693_v40 = vadd.f32 %v649_v24, %v517_v62 }
 0x11b   : > { %v842_v52 = vadd.f32 %v798_v23, %v693_v40  ;;  %v4171_v23 = vld [vmem:[#allocation2 + $0xf9] sm:$0xff] }
 0x11c   : > { %v950_v51 = vpop.f32.mrf.mxu0 }
 0x11d   : > { %v1099_v39 = vpop.f32.mrf.mxu1  ;;  %v991_v18 = vadd.f32 %v947_v45, %v842_v52  ;;  %3174 = vmatmul.msk.f32.gmra.mxu2 %vm169_vm1, %v3857_v56  ;;  %v248_v52 = vld [vmem:[%s3599_s5 + $0xb8] sm:$0xff] }
 0x11e   : > { %3191 = vmatmul.msk.f32.gmra.mxu3 %vm169_vm1, %v3855_v55  ;;  %281 = vst.msk [vmem:[#allocation2 + $0x129] sm:$0xff] %vm169_vm1, %v248_v52 }
 0x11f   : > { %v4147_v19 = vadd.f32 %v1096_v21, %v991_v18  ;;  %3208 = vmatmul.msk.f32.gmra.mxu0 %vm169_vm1, %v3903_v0  ;;  %v523_v0 = vadd.f32 %v4007_v36, %v4005_v35  ;;  %v4187_v18 = vld [vmem:[#allocation2 + $0x109] sm:$0xff] }
 0x120   : > { %3225 = vmatmul.msk.f32.gmra.mxu1 %vm169_vm1, %v4139_v61  ;;  %v652_v17 = vpop.f32.mrf.mxu2 }
 0x121   : > { %v801_v4 = vpop.f32.mrf.mxu3  ;;  %v694_v58 = vadd.f32 %v652_v17, %v520_v63 }
 0x123   : > { %v843_v56 = vadd.f32 %v801_v4, %v694_v58  ;;  %v249_v4 = vld [vmem:[%s3599_s5 + $0xc0] sm:$0xff] }
 0x124   : > { %v953_v55 = vpop.f32.mrf.mxu0  ;;  %282 = vst.msk [vmem:[#allocation2 + $0x139] sm:$0xff] %vm169_vm1, %v249_v4 }
 0x125   : > { %v1102_v31 = vpop.f32.mrf.mxu1  ;;  %v992_v25 = vadd.f32 %v950_v51, %v843_v56  ;;  %3175 = vmatmul.msk.f32.gmra.mxu2 %vm169_vm1, %v3631_v7  ;;  %v4203_v56 = vld [vmem:[#allocation2 + $0x111] sm:$0xff] }
 0x126   : > { %3192 = vmatmul.msk.f32.gmra.mxu3 %vm169_vm1, %v3627_v6 }
 0x127   : > { %v4163_v28 = vadd.f32 %v1099_v39, %v992_v25  ;;  %3209 = vmatmul.msk.f32.gmra.mxu0 %vm169_vm1, %v3913_v1  ;;  %v526_v1 = vadd.f32 %v4031_v60, %v4029_v59  ;;  %v250_v25 = vld [vmem:[%s3599_s5 + $0xc8] sm:$0xff] }
 0x128   : > { %3226 = vmatmul.msk.f32.gmra.mxu1 %vm169_vm1, %v4155_v46  ;;  %v655_v45 = vpop.f32.mrf.mxu2  ;;  %283 = vst.msk [vmem:[#allocation2 + $0x141] sm:$0xff] %vm169_vm1, %v250_v25 }
 0x129   : > { %v804_v21 = vpop.f32.mrf.mxu3  ;;  %v695_v62 = vadd.f32 %v655_v45, %v523_v0 }
 0x12b   : > { %v844_v7 = vadd.f32 %v804_v21, %v695_v62  ;;  %v4219_v21 = vld [vmem:[#allocation2 + $0x121] sm:$0xff] }
 0x12c   : > { %v956_v6 = vpop.f32.mrf.mxu0 }
 0x12d   : > { %v1105_v24 = vpop.f32.mrf.mxu1  ;;  %v993_v35 = vadd.f32 %v953_v55, %v844_v7  ;;  %3176 = vmatmul.msk.f32.gmra.mxu2 %vm169_vm1, %v3716_v15  ;;  %v251_v7 = vld [vmem:[%s3599_s5 + $0xd0] sm:$0xff] }
 0x12e   : > { %3193 = vmatmul.msk.f32.gmra.mxu3 %vm169_vm1, %v3712_v14  ;;  %284 = vst.msk [vmem:[#allocation2 + $0x151] sm:$0xff] %vm169_vm1, %v251_v7  ;;  %v2519_v7 = vld [vmem:[%s4923_s1 + $0x18] sm:$0xf] }
 0x12f   : > { %v4179_v36 = vadd.f32 %v1102_v31, %v993_v35  ;;  %3210 = vmatmul.msk.f32.gmra.mxu0 %vm169_vm1, %v3923_v2  ;;  %v529_v2 = vadd.f32 %v4057_v48, %v4055_v47  ;;  %v4235_v35 = vld [vmem:[#allocation2 + $0x129] sm:$0xff]  ;;  %3323 = vmatpush.msk.msra.mxu3 %vm373_vm0, %v2519_v7 }
 0x130   : > { %3227 = vmatmul.msk.f32.gmra.mxu1 %vm169_vm1, %v4171_v23  ;;  %v658_v54 = vpop.f32.mrf.mxu2 }
 0x131   : > { %v807_v40 = vpop.f32.mrf.mxu3  ;;  %v696_v51 = vadd.f32 %v658_v54, %v526_v1 }
 0x133   : > { %v845_v15 = vadd.f32 %v807_v40, %v696_v51  ;;  %v252_v40 = vld [vmem:[%s3599_s5 + $0xd8] sm:$0xff] }
 0x134   : > { %v959_v14 = vpop.f32.mrf.mxu0  ;;  %285 = vst.msk [vmem:[#allocation2 + $0x159] sm:$0xff] %vm169_vm1, %v252_v40  ;;  %v4961_v40 = vld [vmem:[#allocation16_spill] sm:$0xff] }
 0x135   : > { %v1108_v39 = vpop.f32.mrf.mxu1  ;;  %v994_v59 = vadd.f32 %v956_v6, %v845_v15  ;;  %3177 = vmatmul.msk.f32.gmra.mxu2 %vm169_vm1, %v3761_v27  ;;  %v4251_v15 = vld [vmem:[#allocation2 + $0x139] sm:$0xff] }
 0x136   : > { %3194 = vmatmul.msk.f32.gmra.mxu3 %vm169_vm1, %v3759_v26 }
 0x137   : > { %v4195_v60 = vadd.f32 %v1105_v24, %v994_v59  ;;  %3211 = vmatmul.msk.f32.gmra.mxu0 %vm169_vm1, %v3941_v9  ;;  %v532_v9 = vadd.f32 %v4079_v53, %v4077_v34  ;;  %v4953_v59 = vld [vmem:[#allocation8_spill] sm:$0xff] }
 0x138   : > { %3228 = vmatmul.msk.f32.gmra.mxu1 %vm169_vm1, %v4187_v18  ;;  %v661_v63 = vpop.f32.mrf.mxu2 }
 0x139   : > { %v810_v17 = vpop.f32.mrf.mxu3  ;;  %v697_v30 = vadd.f32 %v661_v63, %v529_v2 }
 0x13b   : > { %v846_v27 = vadd.f32 %v810_v17, %v697_v30  ;;  %v4954_v30 = vld [vmem:[#allocation7_spill] sm:$0xff] }
 0x13c   : > { %v962_v26 = vpop.f32.mrf.mxu0 }
 0x13d   : > { %v1111_v58 = vpop.f32.mrf.mxu1  ;;  %v995_v47 = vadd.f32 %v959_v14, %v846_v27  ;;  %3178 = vmatmul.msk.f32.gmra.mxu2 %vm169_vm1, %v3777_v33 }
 0x13e   : > { %3195 = vmatmul.msk.f32.gmra.mxu3 %vm169_vm1, %v3775_v32 }
 0x13f   : > { %v4211_v48 = vadd.f32 %v1108_v39, %v995_v47  ;;  %3212 = vmatmul.msk.f32.gmra.mxu0 %vm169_vm1, %v3955_v12  ;;  %v535_v12 = vadd.f32 %v3939_v8, %v3937_v5  ;;  %v538_v8 = vadd.f32 %v3963_v16, %v3961_v13  ;;  %v253_v39 = vld [vmem:[%s3599_s5 + $0xe0] sm:$0xff] }
 0x140   : > { %3229 = vmatmul.msk.f32.gmra.mxu1 %vm169_vm1, %v4203_v56  ;;  %v664_v55 = vpop.f32.mrf.mxu2  ;;  %286 = vst.msk [vmem:[#allocation2 + $0x169] sm:$0xff] %vm169_vm1, %v253_v39  ;;  %v4321_v39 = vld [vmem:[#allocation2 + $0xd8] sm:$0xff] }
 0x141   : > { %v813_v31 = vpop.f32.mrf.mxu3  ;;  %v698_v0 = vadd.f32 %v664_v55, %v532_v9  ;;  %v254_v9 = vld [vmem:[%s3599_s5 + $0xe8] sm:$0xff] }
 0x142   : > { %v4957_v55 = vld [vmem:[#allocation9_spill] sm:$0xff]  ;;  %287 = vst.msk [vmem:[#allocation2 + $0x171] sm:$0xff] %vm169_vm1, %v254_v9  ;;  %v4340_v9 = vld [vmem:[#allocation2 + $0xe0] sm:$0xff] }
 0x143   : > { %v847_v33 = vadd.f32 %v813_v31, %v698_v0 }
 0x144   : > { %v965_v32 = vpop.f32.mrf.mxu0 }
 0x145   : > { %v1114_v45 = vpop.f32.mrf.mxu1  ;;  %v996_v53 = vadd.f32 %v962_v26, %v847_v33  ;;  %3179 = vmatmul.msk.f32.gmra.mxu2 %vm169_vm1, %v3789_v38  ;;  %v4956_v26 = vld [vmem:[#allocation11_spill] sm:$0xff] }
 0x146   : > { %3196 = vmatmul.msk.f32.gmra.mxu3 %vm169_vm1, %v3787_v37 }
 0x147   : > { %v4227_v34 = vadd.f32 %v1111_v58, %v996_v53  ;;  %3213 = vmatmul.msk.f32.gmra.mxu0 %vm169_vm1, %v3975_v20  ;;  %v4958_v53 = vld [vmem:[#allocation13_spill] sm:$0xff] }
 0x148   : > { %3230 = vmatmul.msk.f32.gmra.mxu1 %vm169_vm1, %v4219_v21  ;;  %v667_v10 = vpop.f32.mrf.mxu2 }
 0x149   : > { %v816_v62 = vpop.f32.mrf.mxu3  ;;  %v699_v6 = vadd.f32 %v667_v10, %v535_v12  ;;  %v2369_v12 = vld [vmem:[%s4923_s1 + $0x14] sm:$0xf] }
 0x14a   : > { %3306 = vmatpush.msk.msra.mxu2 %vm373_vm0, %v2369_v12 }
 0x14b   : > { %v848_v38 = vadd.f32 %v816_v62, %v699_v6  ;;  %v4959_v62 = vld [vmem:[#allocation14_spill] sm:$0xff] }
 0x14c   : > { %v968_v37 = vpop.f32.mrf.mxu0 }
 0x14d   : > { %v1117_v24 = vpop.f32.mrf.mxu1  ;;  %v997_v5 = vadd.f32 %v965_v32, %v848_v38  ;;  %3180 = vmatmul.msk.f32.gmra.mxu2 %vm169_vm1, %v3813_v44  ;;  %v4281_v32 = vld [vmem:[#allocation2 + $0x151] sm:$0xff] }
 0x14e   : > { %3197 = vmatmul.msk.f32.gmra.mxu3 %vm169_vm1, %v3811_v43  ;;  %v4960_v38 = vld [vmem:[#allocation10_spill] sm:$0xff] }
 0x14f   : > { %v4243_v20 = vadd.f32 %v1114_v45, %v997_v5  ;;  %3214 = vmatmul.msk.f32.gmra.mxu0 %vm169_vm1, %v3993_v29 }
 0x150   : > { %3231 = vmatmul.msk.f32.gmra.mxu1 %vm169_vm1, %v4235_v35  ;;  %v670_v1 = vpop.f32.mrf.mxu2 }
 0x151   : > { %v819_v54 = vpop.f32.mrf.mxu3  ;;  %v700_v52 = vadd.f32 %v670_v1, %v538_v8  ;;  %v4302_v1 = vld [vmem:[#allocation2 + $0x159] sm:$0xff] }
 0x153   : > { %v849_v44 = vadd.f32 %v819_v54, %v700_v52 }
 0x154   : > { %v971_v43 = vpop.f32.mrf.mxu0 }
 0x155   : > { %v1120_v51 = vpop.f32.mrf.mxu1  ;;  %v998_v13 = vadd.f32 %v968_v37, %v849_v44  ;;  %3181 = vmatmul.msk.f32.gmra.mxu2 %vm169_vm1, %v3837_v50  ;;  %v4962_v44 = vld [vmem:[#allocation17_spill] sm:$0xff] }
 0x156   : > { %3198 = vmatmul.msk.f32.gmra.mxu3 %vm169_vm1, %v3835_v49  ;;  %v4266_v49 = vld [vmem:[#allocation2 + $0x141] sm:$0xff] }
 0x157   : > { %v4257_v16 = vadd.f32 %v1117_v24, %v998_v13  ;;  %3215 = vmatmul.msk.f32.gmra.mxu0 %vm169_vm1, %v4009_v41  ;;  %v4955_v41 = vld [vmem:[#allocation6_spill] sm:$0xff]  ;;  %v4963_v13 = vld [vmem:[#allocation12_spill] sm:$0xff] }
 0x158   : > { %3232 = vmatmul.msk.f32.gmra.mxu1 %vm169_vm1, %v4251_v15  ;;  %v673_v29 = vpop.f32.mrf.mxu2 }
 0x159   : > { %v822_v14 = vpop.f32.mrf.mxu3  ;;  %v701_v2 = vadd.f32 %v673_v29, %v4953_v59 }
 0x15b   : > { %v850_v50 = vadd.f32 %v822_v14, %v701_v2  ;;  %v2668_v14 = vld [vmem:[%s4923_s1 + $0x1c] sm:$0xf] }
 0x15c   : > { %v974_v63 = vpop.f32.mrf.mxu0  ;;  %3340 = vmatpush.msk.msra.mxu0 %vm373_vm0, %v2668_v14 }
 0x15d   : > { %v1123_v17 = vpop.f32.mrf.mxu1  ;;  %v999_v4 = vadd.f32 %v971_v43, %v850_v50  ;;  %3182 = vmatmul.msk.f32.gmra.mxu2 %vm169_vm1, %v4954_v30 }
 0x15e   : > { %3199 = vmatmul.msk.f32.gmra.mxu3 %vm169_vm1, %v4955_v41 }
 0x15f   : > { %v4272_v27 = vadd.f32 %v1120_v51, %v999_v4  ;;  %3216 = vmatmul.msk.f32.gmra.mxu0 %vm169_vm1, %v4956_v26 }
 0x160   : > { %3233 = vmatmul.msk.f32.gmra.mxu1 %vm169_vm1, %v4266_v49  ;;  %v676_v58 = vpop.f32.mrf.mxu2 }
 0x161   : > { %v825_v47 = vpop.f32.mrf.mxu3  ;;  %v702_v31 = vadd.f32 %v676_v58, %v4957_v55  ;;  %v4964_v58 = vld [vmem:[#allocation15_spill] sm:$0xff] }
 0x163   : > { %v851_v25 = vadd.f32 %v825_v47, %v702_v31 }
 0x164   : > { %v977_v0 = vpop.f32.mrf.mxu0 }
 0x165   : > { %v1126_v33 = vpop.f32.mrf.mxu1  ;;  %v1000_v45 = vadd.f32 %v974_v63, %v851_v25  ;;  %3183 = vmatmul.msk.f32.gmra.mxu2 %vm169_vm1, %v4958_v53  ;;  %v4325_v63 = vld [vmem:[#allocation2 + $0xda] sm:$0xff] }
 0x166   : > { %3200 = vmatmul.msk.f32.gmra.mxu3 %vm169_vm1, %v4059_v57 }
 0x167   : > { %v4291_v10 = vadd.f32 %v1123_v17, %v1000_v45  ;;  %3217 = vmatmul.msk.f32.gmra.mxu0 %vm169_vm1, %v4959_v62  ;;  %v4327_v17 = vld [vmem:[#allocation2 + $0x169] sm:$0xff] }
 0x168   : > { %3234 = vmatmul.msk.f32.gmra.mxu1 %vm169_vm1, %v4281_v32  ;;  %v679_v6 = vpop.f32.mrf.mxu2 }
 0x169   : > { %v828_v57 = vpop.f32.mrf.mxu3  ;;  %v703_v37 = vadd.f32 %v679_v6, %v4960_v38 }
 0x16b   : > { %v852_v24 = vadd.f32 %v828_v57, %v703_v37  ;;  %v4965_v57 = vld [vmem:[#allocation18_spill] sm:$0xff] }
 0x16c   : > { %v980_v5 = vpop.f32.mrf.mxu0 }
 0x16d   : > { %v1129_v8 = vpop.f32.mrf.mxu1  ;;  %v1001_v54 = vadd.f32 %v977_v0, %v852_v24  ;;  %3184 = vmatmul.msk.f32.gmra.mxu2 %vm169_vm1, %v4961_v40  ;;  %v4342_v0 = vld [vmem:[#allocation2 + $0xe2] sm:$0xff] }
 0x16e   : > { %3201 = vmatmul.msk.f32.gmra.mxu3 %vm169_vm1, %v4081_v42  ;;  %v2817_v42 = vld [vmem:[%s4923_s1 + $0x20] sm:$0xf] }
 0x16f   : > { %v4308_v52 = vadd.f32 %v1126_v33, %v1001_v54  ;;  %3218 = vmatmul.msk.f32.gmra.mxu0 %vm169_vm1, %v4962_v44  ;;  %3357 = vmatpush.msk.msra.mxu1 %vm373_vm0, %v2817_v42  ;;  %v4344_v33 = vld [vmem:[#allocation2 + $0x171] sm:$0xff] }
 0x170   : > { %3235 = vmatmul.msk.f32.gmra.mxu1 %vm169_vm1, %v4302_v1  ;;  %v682_v43 = vpop.f32.mrf.mxu2 }
 0x171   : > { %v831_v51 = vpop.f32.mrf.mxu3  ;;  %v704_v29 = vadd.f32 %v682_v43, %v4963_v13 }
 0x173   : > { %v853_v59 = vadd.f32 %v831_v51, %v704_v29 }
 0x174   : > { %v983_v2 = vpop.f32.mrf.mxu0 }
 0x175   : > { %v1132_v50 = vpop.f32.mrf.mxu1  ;;  %v1002_v4 = vadd.f32 %v980_v5, %v853_v59  ;;  %3185 = vmatmul.msk.f32.gmra.mxu2 %vm169_vm1, %v4321_v39 }
 0x176   : > { %3202 = vmatmul.msk.f32.gmra.mxu3 %vm169_vm1, %v4123_v22 }
 0x177   : > { %v4333_v30 = vadd.f32 %v1129_v8, %v1002_v4  ;;  %3219 = vmatmul.msk.f32.gmra.mxu0 %vm169_vm1, %v4325_v63  ;;  %v4396_v4 = vld [vmem:[#allocation2 + $0xf0] sm:$0xff] }
 0x178   : > { %3236 = vmatmul.msk.f32.gmra.mxu1 %vm169_vm1, %v4327_v17  ;;  %v685_v41 = vpop.f32.mrf.mxu2 }
 0x179   : > { %v834_v26 = vpop.f32.mrf.mxu3  ;;  %v705_v47 = vadd.f32 %v685_v41, %v4964_v58 }
 0x17b   : > { %v854_v55 = vadd.f32 %v834_v26, %v705_v47 }
 0x17c   : > { %v986_v31 = vpop.f32.mrf.mxu0 }
 0x17d   : > { %v1135_v25 = vpop.f32.mrf.mxu1  ;;  %v1003_v45 = vadd.f32 %v983_v2, %v854_v55  ;;  %3186 = vmatmul.msk.f32.gmra.mxu2 %vm169_vm1, %v4340_v9 }
 0x17e   : > { %3203 = vmatmul.msk.f32.gmra.mxu3 %vm169_vm1, %v4139_v61 }
 0x17f   : > { %v4350_v12 = vadd.f32 %v1132_v50, %v1003_v45  ;;  %3220 = vmatmul.msk.f32.gmra.mxu0 %vm169_vm1, %v4342_v0 }
 0x180   : > { %3237 = vmatmul.msk.f32.gmra.mxu1 %vm169_vm1, %v4344_v33  ;;  %v688_v7 = vpop.f32.mrf.mxu2 }
 0x181   : > { %v837_v6 = vpop.f32.mrf.mxu3  ;;  %v706_v38 = vadd.f32 %v688_v7, %v4965_v57  ;;  %v4426_v57 = vld [vmem:[#allocation2 + $0xf2] sm:$0xff] }
 0x183   : > { %v855_v37 = vadd.f32 %v837_v6, %v706_v38 }
 0x184   : > { %v1538_v24 = vpop.f32.mrf.mxu0 }
 0x185   : > { %v4357_v5 = vpop.f32.mrf.mxu1  ;;  %v1004_v8 = vadd.f32 %v986_v31, %v855_v37  ;;  %3239 = vmatmul.msk.f32.vlgmr.msrb.gmra.mxu2 %vm169_vm1, %v4958_v53  ;;  %v4376_v53 = vld [vmem:[%s4924_s2] ss:$0 sm:$0xff]  ;;  %v4412_v31 = vld [vmem:[#allocation2 + $0xf8] sm:$0xff] }
 0x186   : > { %3256 = vmatmul.msk.f32.vlgmr.msrb.gmra.mxu3 %vm169_vm1, %v4959_v62 }
 0x187   : > { %v4363_v54 = vadd.f32 %v1135_v25, %v1004_v8  ;;  %3273 = vmatmul.msk.f32.vlgmr.msrb.gmra.mxu0 %vm169_vm1, %v4321_v39 }
 0x188   : > { %3290 = vmatmul.msk.f32.vlgmr.msrb.gmra.mxu1 %vm169_vm1, %v4123_v22  ;;  %v1240_v43 = vpop.f32.mrf.mxu2 }
 0x189   : > { %v1389_v51 = vpop.f32.mrf.mxu3  ;;  %v1288_v13 = vadd.f32 %v1240_v43, %v4115_v3 }
 0x18b   : > { %v1437_v29 = vadd.f32 %v1389_v51, %v1288_v13 }
 0x18c   : > { %v1541_v62 = vpop.f32.mrf.mxu0 }
 0x18d   : > { %v4378_v14 = vpop.f32.mrf.mxu1  ;;  %v1586_v42 = vadd.f32 %v1538_v24, %v1437_v29  ;;  %3240 = vmatmul.msk.f32.gmra.mxu2 %vm169_vm1, %v4961_v40  ;;  %v4430_v24 = vld [vmem:[#allocation2 + $0x108] sm:$0xff]  ;;  %v4444_v29 = vld [vmem:[#allocation2 + $0xfa] sm:$0xff] }
 0x18e   : > { %3257 = vmatmul.msk.f32.gmra.mxu3 %vm169_vm1, %v4962_v44 }
 0x18f   : > { %v1605_v3 = vadd.f32 %v4376_v53, %v1586_v42  ;;  %3274 = vmatmul.msk.f32.gmra.mxu0 %vm169_vm1, %v4340_v9 }
 0x190   : > { %3291 = vmatmul.msk.f32.gmra.mxu1 %vm169_vm1, %v4139_v61  ;;  %v1243_v22 = vpop.f32.mrf.mxu2 }
 0x191   : > { %v1392_v59 = vpop.f32.mrf.mxu3  ;;  %1622 = vst.msk [vmem:[%s4389_s8] sm:$0xff] %vm1621_vm3, %v1605_v3  ;;  %v1289_v40 = vadd.f32 %v1243_v22, %v4131_v11  ;;  %v4448_v22 = vld [vmem:[#allocation2 + $0x110] sm:$0xff] }
 0x193   : > { %v1438_v44 = vadd.f32 %v1392_v59, %v1289_v40 }
 0x194   : > { %v1544_v2 = vpop.f32.mrf.mxu0 }
 0x195   : > { %v4394_v50 = vpop.f32.mrf.mxu1  ;;  %v1587_v41 = vadd.f32 %v1541_v62, %v1438_v44  ;;  %3241 = vmatmul.msk.f32.gmra.mxu2 %vm169_vm1, %v4321_v39 }
 0x196   : > { %3258 = vmatmul.msk.f32.gmra.mxu3 %vm169_vm1, %v4325_v63 }
 0x197   : > { %v1606_v61 = vadd.f32 %v4376_v53, %v1587_v41  ;;  %3275 = vmatmul.msk.f32.gmra.mxu0 %vm169_vm1, %v4396_v4  ;;  %v4462_v41 = vld [vmem:[#allocation2 + $0x10a] sm:$0xff] }
 0x198   : > { %3292 = vmatmul.msk.f32.gmra.mxu1 %vm169_vm1, %v4155_v46  ;;  %v1246_v11 = vpop.f32.mrf.mxu2 }
 0x199   : > { %v1395_v26 = vpop.f32.mrf.mxu3  ;;  %1623 = vst.msk [vmem:[%s4389_s8 + $0x8] sm:$0xff] %vm1621_vm3, %v1606_v61  ;;  %v1290_v58 = vadd.f32 %v1246_v11, %v4147_v19 }
 0x19b   : > { %v1439_v47 = vadd.f32 %v1395_v26, %v1290_v58  ;;  %v4466_v58 = vld [vmem:[#allocation2 + $0x120] sm:$0xff] }
 0x19c   : > { %v1547_v39 = vpop.f32.mrf.mxu0 }
 0x19d   : > { %v4410_v55 = vpop.f32.mrf.mxu1  ;;  %v1588_v25 = vadd.f32 %v1544_v2, %v1439_v47  ;;  %3242 = vmatmul.msk.f32.gmra.mxu2 %vm169_vm1, %v4340_v9 }
 0x19e   : > { %3259 = vmatmul.msk.f32.gmra.mxu3 %vm169_vm1, %v4342_v0 }
 0x19f   : > { %v1607_v45 = vadd.f32 %v4376_v53, %v1588_v25  ;;  %3276 = vmatmul.msk.f32.gmra.mxu0 %vm169_vm1, %v4412_v31 }
 0x1a0   : > { %3293 = vmatmul.msk.f32.gmra.mxu1 %vm169_vm1, %v4171_v23  ;;  %v1249_v19 = vpop.f32.mrf.mxu2 }
 0x1a1   : > { %v1398_v7 = vpop.f32.mrf.mxu3  ;;  %1624 = vst.msk [vmem:[%s4389_s8 + $0x10] sm:$0xff] %vm1621_vm3, %v1607_v45  ;;  %v1291_v6 = vadd.f32 %v1249_v19, %v4163_v28  ;;  %v4480_v19 = vld [vmem:[#allocation2 + $0x112] sm:$0xff] }
 0x1a3   : > { %v1440_v9 = vadd.f32 %v1398_v7, %v1291_v6 }
 0x1a4   : > { %v1550_v38 = vpop.f32.mrf.mxu0 }
 0x1a5   : > { %v4428_v37 = vpop.f32.mrf.mxu1  ;;  %v1589_v8 = vadd.f32 %v1547_v39, %v1440_v9  ;;  %3243 = vmatmul.msk.f32.gmra.mxu2 %vm169_vm1, %v4396_v4 }
 0x1a6   : > { %3260 = vmatmul.msk.f32.gmra.mxu3 %vm169_vm1, %v4426_v57 }
 0x1a7   : > { %v1608_v43 = vadd.f32 %v4376_v53, %v1589_v8  ;;  %3277 = vmatmul.msk.f32.gmra.mxu0 %vm169_vm1, %v4430_v24 }
 0x1a8   : > { %3294 = vmatmul.msk.f32.gmra.mxu1 %vm169_vm1, %v4187_v18  ;;  %v1252_v28 = vpop.f32.mrf.mxu2 }
 0x1a9   : > { %v1401_v51 = vpop.f32.mrf.mxu3  ;;  %1625 = vst.msk [vmem:[%s4389_s8 + $0x18] sm:$0xff] %vm1621_vm3, %v1608_v43  ;;  %v1292_v13 = vadd.f32 %v1252_v28, %v4179_v36 }
 0x1ab   : > { %v1441_v62 = vadd.f32 %v1401_v51, %v1292_v13  ;;  %v4498_v13 = vld [vmem:[#allocation2 + $0x122] sm:$0xff] }
 0x1ac   : > { %v1553_v42 = vpop.f32.mrf.mxu0 }
 0x1ad   : > { %v4446_v3 = vpop.f32.mrf.mxu1  ;;  %v1590_v59 = vadd.f32 %v1550_v38, %v1441_v62  ;;  %3244 = vmatmul.msk.f32.gmra.mxu2 %vm169_vm1, %v4412_v31  ;;  %v4484_v38 = vld [vmem:[#allocation2 + $0x128] sm:$0xff] }
 0x1ae   : > { %3261 = vmatmul.msk.f32.gmra.mxu3 %vm169_vm1, %v4444_v29 }
 0x1af   : > { %v1609_v40 = vadd.f32 %v4376_v53, %v1590_v59  ;;  %3278 = vmatmul.msk.f32.gmra.mxu0 %vm169_vm1, %v4448_v22 }
 0x1b0   : > { %3295 = vmatmul.msk.f32.gmra.mxu1 %vm169_vm1, %v4203_v56  ;;  %v1255_v36 = vpop.f32.mrf.mxu2 }
 0x1b1   : > { %v1404_v44 = vpop.f32.mrf.mxu3  ;;  %1626 = vst.msk [vmem:[%s4389_s8 + $0x20] sm:$0xff] %vm1621_vm3, %v1609_v40  ;;  %v1293_v2 = vadd.f32 %v1255_v36, %v4195_v60  ;;  %v4502_v40 = vld [vmem:[#allocation2 + $0x138] sm:$0xff] }
 0x1b3   : > { %v1442_v61 = vadd.f32 %v1404_v44, %v1293_v2 }
 0x1b4   : > { %v1556_v11 = vpop.f32.mrf.mxu0 }
 0x1b5   : > { %v4464_v26 = vpop.f32.mrf.mxu1  ;;  %v1591_v47 = vadd.f32 %v1553_v42, %v1442_v61  ;;  %3245 = vmatmul.msk.f32.gmra.mxu2 %vm169_vm1, %v4430_v24 }
 0x1b6   : > { %3262 = vmatmul.msk.f32.gmra.mxu3 %vm169_vm1, %v4462_v41 }
 0x1b7   : > { %v1610_v39 = vadd.f32 %v4376_v53, %v1591_v47  ;;  %3279 = vmatmul.msk.f32.gmra.mxu0 %vm169_vm1, %v4466_v58 }
 0x1b8   : > { %3296 = vmatmul.msk.f32.gmra.mxu1 %vm169_vm1, %v4219_v21  ;;  %v1258_v60 = vpop.f32.mrf.mxu2 }
 0x1b9   : > { %v1407_v25 = vpop.f32.mrf.mxu3  ;;  %1627 = vst.msk [vmem:[%s4389_s8 + $0x28] sm:$0xff] %vm1621_vm3, %v1610_v39  ;;  %v1294_v45 = vadd.f32 %v1258_v60, %v4211_v48 }
 0x1bb   : > { %v1443_v7 = vadd.f32 %v1407_v25, %v1294_v45  ;;  %v4520_v25 = vld [vmem:[#allocation2 + $0x140] sm:$0xff] }
 0x1bc   : > { %v1559_v6 = vpop.f32.mrf.mxu0 }
 0x1bd   : > { %v4482_v9 = vpop.f32.mrf.mxu1  ;;  %v1592_v8 = vadd.f32 %v1556_v11, %v1443_v7  ;;  %3246 = vmatmul.msk.f32.gmra.mxu2 %vm169_vm1, %v4448_v22  ;;  %v4516_v11 = vld [vmem:[#allocation2 + $0x12a] sm:$0xff] }
 0x1be   : > { %3263 = vmatmul.msk.f32.gmra.mxu3 %vm169_vm1, %v4480_v19 }
 0x1bf   : > { %v1611_v43 = vadd.f32 %v4376_v53, %v1592_v8  ;;  %3280 = vmatmul.msk.f32.gmra.mxu0 %vm169_vm1, %v4484_v38 }
 0x1c0   : > { %3297 = vmatmul.msk.f32.gmra.mxu1 %vm169_vm1, %v4235_v35  ;;  %v1261_v48 = vpop.f32.mrf.mxu2 }
 0x1c1   : > { %v1410_v28 = vpop.f32.mrf.mxu3  ;;  %1628 = vst.msk [vmem:[%s4389_s8 + $0x30] sm:$0xff] %vm1621_vm3, %v1611_v43  ;;  %v1295_v51 = vadd.f32 %v1261_v48, %v4227_v34  ;;  %v4534_v43 = vld [vmem:[#allocation2 + $0x13a] sm:$0xff] }
 0x1c3   : > { %v1444_v62 = vadd.f32 %v1410_v28, %v1295_v51 }
 0x1c4   : > { %v1562_v42 = vpop.f32.mrf.mxu0 }
 0x1c5   : > { %v4500_v59 = vpop.f32.mrf.mxu1  ;;  %v1593_v36 = vadd.f32 %v1559_v6, %v1444_v62  ;;  %3247 = vmatmul.msk.f32.gmra.mxu2 %vm169_vm1, %v4466_v58  ;;  %v4538_v62 = vld [vmem:[#allocation2 + $0x150] sm:$0xff] }
 0x1c6   : > { %3264 = vmatmul.msk.f32.gmra.mxu3 %vm169_vm1, %v4498_v13 }
 0x1c7   : > { %v1612_v44 = vadd.f32 %v4376_v53, %v1593_v36  ;;  %3281 = vmatmul.msk.f32.gmra.mxu0 %vm169_vm1, %v4502_v40  ;;  %v255_v36 = vld [vmem:[%s3599_s5 + $0xf0] sm:$0xff] }
 0x1c8   : > { %3298 = vmatmul.msk.f32.gmra.mxu1 %vm169_vm1, %v4251_v15  ;;  %v1264_v34 = vpop.f32.mrf.mxu2  ;;  %288 = vst.msk [vmem:[#allocation2 + $0x181] sm:$0xff] %vm169_vm1, %v255_v36 }
 0x1c9   : > { %v1413_v2 = vpop.f32.mrf.mxu3  ;;  %1629 = vst.msk [vmem:[%s4389_s8 + $0x38] sm:$0xff] %vm1621_vm3, %v1612_v44  ;;  %v1296_v61 = vadd.f32 %v1264_v34, %v4243_v20 }
 0x1cb   : > { %v1445_v47 = vadd.f32 %v1413_v2, %v1296_v61  ;;  %v4554_v61 = vld [vmem:[#allocation2 + $0x142] sm:$0xff] }
 0x1cc   : > { %v1565_v39 = vpop.f32.mrf.mxu0 }
 0x1cd   : > { %v4518_v60 = vpop.f32.mrf.mxu1  ;;  %v1594_v45 = vadd.f32 %v1562_v42, %v1445_v47  ;;  %3248 = vmatmul.msk.f32.gmra.mxu2 %vm169_vm1, %v4484_v38 }
 0x1ce   : > { %3265 = vmatmul.msk.f32.gmra.mxu3 %vm169_vm1, %v4516_v11 }
 0x1cf   : > { %v1613_v7 = vadd.f32 %v4376_v53, %v1594_v45  ;;  %3282 = vmatmul.msk.f32.gmra.mxu0 %vm169_vm1, %v4520_v25 }
 0x1d0   : > { %3299 = vmatmul.msk.f32.gmra.mxu1 %vm169_vm1, %v4266_v49  ;;  %v1267_v20 = vpop.f32.mrf.mxu2 }
 0x1d1   : > { %v1416_v6 = vpop.f32.mrf.mxu3  ;;  %1630 = vst.msk [vmem:[%s4389_s8 + $0x40] sm:$0xff] %vm1621_vm3, %v1613_v7  ;;  %v1297_v8 = vadd.f32 %v1267_v20, %v4257_v16  ;;  %v4558_v7 = vld [vmem:[#allocation2 + $0x158] sm:$0xff] }
 0x1d3   : > { %v1446_v48 = vadd.f32 %v1416_v6, %v1297_v8  ;;  %v256_v6 = vld [vmem:[%s3599_s5 + $0xf8] sm:$0xff] }
 0x1d4   : > { %v1568_v28 = vpop.f32.mrf.mxu0  ;;  %289 = vst.msk [vmem:[#allocation2 + $0x189] sm:$0xff] %vm169_vm1, %v256_v6  ;;  %v4592_v6 = vld [vmem:[#allocation2 + $0x15a] sm:$0xff] }
 0x1d5   : > { %v4536_v51 = vpop.f32.mrf.mxu1  ;;  %v1595_v42 = vadd.f32 %v1565_v39, %v1446_v48  ;;  %3249 = vmatmul.msk.f32.gmra.mxu2 %vm169_vm1, %v4502_v40 }
 0x1d6   : > { %3266 = vmatmul.msk.f32.gmra.mxu3 %vm169_vm1, %v4534_v43 }
 0x1d7   : > { %v1614_v44 = vadd.f32 %v4376_v53, %v1595_v42  ;;  %3283 = vmatmul.msk.f32.gmra.mxu0 %vm169_vm1, %v4538_v62  ;;  %v4574_v42 = vld [vmem:[#allocation2 + $0x152] sm:$0xff] }
 0x1d8   : > { %3300 = vmatmul.msk.f32.gmra.mxu1 %vm169_vm1, %v4281_v32  ;;  %v1270_v16 = vpop.f32.mrf.mxu2 }
 0x1d9   : > { %v1419_v34 = vpop.f32.mrf.mxu3  ;;  %1631 = vst.msk [vmem:[%s4389_s8 + $0x48] sm:$0xff] %vm1621_vm3, %v1614_v44  ;;  %v1298_v2 = vadd.f32 %v1270_v16, %v4272_v27 }
 0x1db   : > { %v1447_v47 = vadd.f32 %v1419_v34, %v1298_v2  ;;  %v4578_v34 = vld [vmem:[#allocation2 + $0x168] sm:$0xff] }
 0x1dc   : > { %v1571_v39 = vpop.f32.mrf.mxu0 }
 0x1dd   : > { %v4556_v45 = vpop.f32.mrf.mxu1  ;;  %v1596_v20 = vadd.f32 %v1568_v28, %v1447_v47  ;;  %3250 = vmatmul.msk.f32.gmra.mxu2 %vm169_vm1, %v4520_v25 }
 0x1de   : > { %4966 = vst [vmem:[#allocation8_spill] sm:$0xff] %v4556_v45  ;;  %3267 = vmatmul.msk.f32.gmra.mxu3 %vm169_vm1, %v4554_v61  ;;  %v4636_v45 = vld [vmem:[#allocation2 + $0x189] sm:$0xff] }
 0x1df   : > { %v1615_v8 = vadd.f32 %v4376_v53, %v1596_v20  ;;  %3284 = vmatmul.msk.f32.gmra.mxu0 %vm169_vm1, %v4558_v7 }
 0x1e0   : > { %3301 = vmatmul.msk.f32.gmra.mxu1 %vm169_vm1, %v4302_v1  ;;  %v1273_v27 = vpop.f32.mrf.mxu2 }
 0x1e1   : > { %v1422_v48 = vpop.f32.mrf.mxu3  ;;  %1632 = vst.msk [vmem:[%s4389_s8 + $0x50] sm:$0xff] %vm1621_vm3, %v1615_v8  ;;  %v1299_v28 = vadd.f32 %v1273_v27, %v4291_v10 }
 0x1e3   : > { %v1448_v36 = vadd.f32 %v1422_v48, %v1299_v28  ;;  %v4596_v28 = vld [vmem:[#allocation2 + $0x170] sm:$0xff] }
 0x1e4   : > { %v1574_v44 = vpop.f32.mrf.mxu0 }
 0x1e5   : > { %v4576_v16 = vpop.f32.mrf.mxu1  ;;  %v1597_v2 = vadd.f32 %v1571_v39, %v1448_v36  ;;  %3251 = vmatmul.msk.f32.gmra.mxu2 %vm169_vm1, %v4538_v62 }
 0x1e6   : > { %4967 = vst [vmem:[#allocation7_spill] sm:$0xff] %v4576_v16  ;;  %3268 = vmatmul.msk.f32.gmra.mxu3 %vm169_vm1, %v4574_v42 }
 0x1e7   : > { %v1616_v47 = vadd.f32 %v4376_v53, %v1597_v2  ;;  %3285 = vmatmul.msk.f32.gmra.mxu0 %vm169_vm1, %v4578_v34 }
 0x1e8   : > { %3302 = vmatmul.msk.f32.gmra.mxu1 %vm169_vm1, %v4327_v17  ;;  %v1276_v10 = vpop.f32.mrf.mxu2 }
 0x1e9   : > { %v1425_v20 = vpop.f32.mrf.mxu3  ;;  %1633 = vst.msk [vmem:[%s4389_s8 + $0x58] sm:$0xff] %vm1621_vm3, %v1616_v47  ;;  %v1300_v39 = vadd.f32 %v1276_v10, %v4308_v52  ;;  %v4610_v10 = vld [vmem:[#allocation2 + $0x16a] sm:$0xff] }
 0x1eb   : > { %v1449_v8 = vadd.f32 %v1425_v20, %v1300_v39 }
 0x1ec   : > { %v1577_v27 = vpop.f32.mrf.mxu0 }
 0x1ed   : > { %v4594_v48 = vpop.f32.mrf.mxu1  ;;  %v1598_v36 = vadd.f32 %v1574_v44, %v1449_v8  ;;  %3252 = vmatmul.msk.f32.gmra.mxu2 %vm169_vm1, %v4558_v7 }
 0x1ee   : > { %4968 = vst [vmem:[#allocation6_spill] sm:$0xff] %v4594_v48  ;;  %3269 = vmatmul.msk.f32.gmra.mxu3 %vm169_vm1, %v4592_v6  ;;  %v4616_v48 = vld [vmem:[#allocation2 + $0x181] sm:$0xff] }
 0x1ef   : > { %v1617_v2 = vadd.f32 %v4376_v53, %v1598_v36  ;;  %3286 = vmatmul.msk.f32.gmra.mxu0 %vm169_vm1, %v4596_v28  ;;  %v4614_v36 = vld [vmem:[#allocation2 + $0x180] sm:$0xff] }
 0x1f0   : > { %3303 = vmatmul.msk.f32.gmra.mxu1 %vm169_vm1, %v4344_v33  ;;  %v1279_v52 = vpop.f32.mrf.mxu2  ;;  %4970 = vst [vmem:[#allocation9_spill] sm:$0xff] %v4614_v36 }
 0x1f1   : > { %v1428_v47 = vpop.f32.mrf.mxu3  ;;  %1634 = vst.msk [vmem:[%s4389_s8 + $0x60] sm:$0xff] %vm1621_vm3, %v1617_v2  ;;  %v1301_v44 = vadd.f32 %v1279_v52, %v4333_v30 }
 0x1f3   : > { %v1450_v20 = vadd.f32 %v1428_v47, %v1301_v44  ;;  %v4630_v47 = vld [vmem:[#allocation2 + $0x172] sm:$0xff] }
 0x1f4   : > { %v1580_v39 = vpop.f32.mrf.mxu0 }
 0x1f5   : > { %v4612_v8 = vpop.f32.mrf.mxu1  ;;  %v1599_v16 = vadd.f32 %v1577_v27, %v1450_v20  ;;  %3253 = vmatmul.msk.f32.gmra.mxu2 %vm169_vm1, %v4578_v34 }
 0x1f6   : > { %4969 = vst [vmem:[#allocation11_spill] sm:$0xff] %v4612_v8  ;;  %3270 = vmatmul.msk.f32.gmra.mxu3 %vm169_vm1, %v4610_v10 }
 0x1f7   : > { %v1618_v2 = vadd.f32 %v4376_v53, %v1599_v16  ;;  %3287 = vmatmul.msk.f32.gmra.mxu0 %vm169_vm1, %v4614_v36  ;;  %v4634_v16 = vld [vmem:[#allocation2 + $0x188] sm:$0xff] }
 0x1f8   : > { %3304 = vmatmul.msk.f32.gmra.mxu1 %vm169_vm1, %v4616_v48  ;;  %v1282_v30 = vpop.f32.mrf.mxu2 }
 0x1f9   : > { %v1431_v52 = vpop.f32.mrf.mxu3  ;;  %1635 = vst.msk [vmem:[%s4389_s8 + $0x68] sm:$0xff] %vm1621_vm3, %v1618_v2  ;;  %v1302_v27 = vadd.f32 %v1282_v30, %v4350_v12 }
 0x1fb   : > { %v1451_v44 = vadd.f32 %v1431_v52, %v1302_v27 }
 0x1fc   : > { %v1583_v20 = vpop.f32.mrf.mxu0 }
 0x1fd   : > { %v4632_v8 = vpop.f32.mrf.mxu1  ;;  %v1600_v36 = vadd.f32 %v1580_v39, %v1451_v44  ;;  %3254 = vmatmul.msk.f32.gmra.mxu2 %vm169_vm1, %v4596_v28 }
 0x1fe   : > { %4971 = vst [vmem:[#allocation13_spill] sm:$0xff] %v4632_v8  ;;  %3271 = vmatmul.msk.f32.gmra.mxu3 %vm169_vm1, %v4630_v47 }
 0x1ff   : > { %v1619_v2 = vadd.f32 %v4376_v53, %v1600_v36  ;;  %3288 = vmatmul.msk.f32.gmra.mxu0 %vm169_vm1, %v4634_v16 }
 0x200   : > { %3305 = vmatmul.msk.f32.gmra.mxu1 %vm169_vm1, %v4636_v45  ;;  %v1285_v12 = vpop.f32.mrf.mxu2 }
 0x201   : > { %v1434_v30 = vpop.f32.mrf.mxu3  ;;  %1636 = vst.msk [vmem:[%s4389_s8 + $0x70] sm:$0xff] %vm1621_vm3, %v1619_v2  ;;  %v1303_v39 = vadd.f32 %v1285_v12, %v4363_v54 }
 0x203   : > { %v1452_v52 = vadd.f32 %v1434_v30, %v1303_v39 }
 0x204   : > { %v2140_v27 = vpop.f32.mrf.mxu0 }
 0x205   : > { %v2289_v44 = vpop.f32.mrf.mxu1  ;;  %v1601_v8 = vadd.f32 %v1583_v20, %v1452_v52  ;;  %3307 = vmatmul.msk.f32.vlgmr.msra.gmra.mxu2 %vm169_vm1, %v4325_v63 }
 0x206   : > { %3324 = vmatmul.msk.f32.vlgmr.msra.gmra.mxu3 %vm169_vm1, %v4396_v4 }
 0x207   : > { %v1620_v36 = vadd.f32 %v4376_v53, %v1601_v8  ;;  %3341 = vmatmul.msk.f32.vlgmr.msra.gmra.mxu0 %vm169_vm1, %v4155_v46 }
 0x208   : > { %3358 = vmatmul.msk.f32.vlgmr.msra.gmra.mxu1 %vm169_vm1, %v4426_v57  ;;  %v1857_v2 = vpop.f32.mrf.mxu2 }
 0x209   : > { %v1990_v54 = vpop.f32.mrf.mxu3  ;;  %1637 = vst.msk [vmem:[%s4389_s8 + $0x78] sm:$0xff] %vm1621_vm3, %v1620_v36  ;;  %v1858_v20 = vadd.f32 %v1857_v2, %v4357_v5 }
 0x20b   : > { %v2038_v12 = vadd.f32 %v1990_v54, %v1858_v20 }
 0x20c   : > { %v2143_v30 = vpop.f32.mrf.mxu0 }
 0x20d   : > { %v2292_v63 = vpop.f32.mrf.mxu1  ;;  %v2188_v39 = vadd.f32 %v2140_v27, %v2038_v12  ;;  %3308 = vmatmul.msk.f32.gmra.mxu2 %vm169_vm1, %v4342_v0 }
 0x20e   : > { %3325 = vmatmul.msk.f32.gmra.mxu3 %vm169_vm1, %v4412_v31 }
 0x20f   : > { %v4666_v46 = vadd.f32 %v2289_v44, %v2188_v39  ;;  %3342 = vmatmul.msk.f32.gmra.mxu0 %vm169_vm1, %v4171_v23 }
 0x210   : > { %3359 = vmatmul.msk.f32.gmra.mxu1 %vm169_vm1, %v4444_v29  ;;  %v1860_v4 = vpop.f32.mrf.mxu2 }
 0x211   : > { %v1993_v5 = vpop.f32.mrf.mxu3  ;;  %v1861_v8 = vadd.f32 %v1860_v4, %v4378_v14 }
 0x213   : > { %v2039_v52 = vadd.f32 %v1993_v5, %v1861_v8 }
 0x214   : > { %v2146_v27 = vpop.f32.mrf.mxu0 }
 0x215   : > { %v2295_v36 = vpop.f32.mrf.mxu1  ;;  %v2189_v2 = vadd.f32 %v2143_v30, %v2039_v52  ;;  %3309 = vmatmul.msk.f32.gmra.mxu2 %vm169_vm1, %v4426_v57 }
 0x216   : > { %3326 = vmatmul.msk.f32.gmra.mxu3 %vm169_vm1, %v4430_v24 }
 0x217   : > { %v4677_v0 = vadd.f32 %v2292_v63, %v2189_v2  ;;  %3343 = vmatmul.msk.f32.gmra.mxu0 %vm169_vm1, %v4187_v18 }
 0x218   : > { %3360 = vmatmul.msk.f32.gmra.mxu1 %vm169_vm1, %v4462_v41  ;;  %v1863_v23 = vpop.f32.mrf.mxu2 }
 0x219   : > { %v1996_v14 = vpop.f32.mrf.mxu3  ;;  %v1864_v31 = vadd.f32 %v1863_v23, %v4394_v50 }
 0x21b   : > { %v2040_v44 = vadd.f32 %v1996_v14, %v1864_v31 }
 0x21c   : > { %v2149_v54 = vpop.f32.mrf.mxu0 }
 0x21d   : > { %v2298_v20 = vpop.f32.mrf.mxu1  ;;  %v2190_v12 = vadd.f32 %v2146_v27, %v2040_v44  ;;  %3310 = vmatmul.msk.f32.gmra.mxu2 %vm169_vm1, %v4444_v29 }
 0x21e   : > { %3327 = vmatmul.msk.f32.gmra.mxu3 %vm169_vm1, %v4448_v22 }
 0x21f   : > { %v4688_v57 = vadd.f32 %v2295_v36, %v2190_v12  ;;  %3344 = vmatmul.msk.f32.gmra.mxu0 %vm169_vm1, %v4203_v56 }
 0x220   : > { %3361 = vmatmul.msk.f32.gmra.mxu1 %vm169_vm1, %v4480_v19  ;;  %v1866_v18 = vpop.f32.mrf.mxu2 }
 0x221   : > { %v1999_v50 = vpop.f32.mrf.mxu3  ;;  %v1867_v24 = vadd.f32 %v1866_v18, %v4410_v55 }
 0x223   : > { %v2041_v30 = vadd.f32 %v1999_v50, %v1867_v24 }
 0x224   : > { %v2152_v63 = vpop.f32.mrf.mxu0 }
 0x225   : > { %v2301_v39 = vpop.f32.mrf.mxu1  ;;  %v2191_v4 = vadd.f32 %v2149_v54, %v2041_v30  ;;  %3311 = vmatmul.msk.f32.gmra.mxu2 %vm169_vm1, %v4462_v41 }
 0x226   : > { %3328 = vmatmul.msk.f32.gmra.mxu3 %vm169_vm1, %v4466_v58 }
 0x227   : > { %v4699_v29 = vadd.f32 %v2298_v20, %v2191_v4  ;;  %3345 = vmatmul.msk.f32.gmra.mxu0 %vm169_vm1, %v4219_v21 }
 0x228   : > { %3362 = vmatmul.msk.f32.gmra.mxu1 %vm169_vm1, %v4498_v13  ;;  %v1869_v56 = vpop.f32.mrf.mxu2 }
 0x229   : > { %v2002_v55 = vpop.f32.mrf.mxu3  ;;  %v1870_v22 = vadd.f32 %v1869_v56, %v4428_v37 }
 0x22b   : > { %v2042_v5 = vadd.f32 %v2002_v55, %v1870_v22 }
 0x22c   : > { %v2155_v8 = vpop.f32.mrf.mxu0 }
 0x22d   : > { %v2304_v52 = vpop.f32.mrf.mxu1  ;;  %v2192_v27 = vadd.f32 %v2152_v63, %v2042_v5  ;;  %3312 = vmatmul.msk.f32.gmra.mxu2 %vm169_vm1, %v4480_v19 }
 0x22e   : > { %3329 = vmatmul.msk.f32.gmra.mxu3 %vm169_vm1, %v4484_v38 }
 0x22f   : > { %v4710_v41 = vadd.f32 %v2301_v39, %v2192_v27  ;;  %3346 = vmatmul.msk.f32.gmra.mxu0 %vm169_vm1, %v4235_v35 }
 0x230   : > { %3363 = vmatmul.msk.f32.gmra.mxu1 %vm169_vm1, %v4516_v11  ;;  %v1872_v21 = vpop.f32.mrf.mxu2 }
 0x231   : > { %v2005_v37 = vpop.f32.mrf.mxu3  ;;  %v1873_v58 = vadd.f32 %v1872_v21, %v4446_v3 }
 0x233   : > { %v2043_v36 = vadd.f32 %v2005_v37, %v1873_v58 }
 0x234   : > { %v2158_v2 = vpop.f32.mrf.mxu0 }
 0x235   : > { %v2307_v23 = vpop.f32.mrf.mxu1  ;;  %v2193_v14 = vadd.f32 %v2155_v8, %v2043_v36  ;;  %3313 = vmatmul.msk.f32.gmra.mxu2 %vm169_vm1, %v4498_v13 }
 0x236   : > { %3330 = vmatmul.msk.f32.gmra.mxu3 %vm169_vm1, %v4502_v40 }
 0x237   : > { %v4721_v19 = vadd.f32 %v2304_v52, %v2193_v14  ;;  %3347 = vmatmul.msk.f32.gmra.mxu0 %vm169_vm1, %v4251_v15 }
 0x238   : > { %3364 = vmatmul.msk.f32.gmra.mxu1 %vm169_vm1, %v4534_v43  ;;  %v1875_v35 = vpop.f32.mrf.mxu2 }
 0x239   : > { %v2008_v3 = vpop.f32.mrf.mxu3  ;;  %v1876_v38 = vadd.f32 %v1875_v35, %v4464_v26 }
 0x23b   : > { %v2044_v31 = vadd.f32 %v2008_v3, %v1876_v38  ;;  %v4974_v3 = vld [vmem:[#allocation7_spill] sm:$0xff] }
 0x23c   : > { %v2161_v44 = vpop.f32.mrf.mxu0 }
 0x23d   : > { %v2310_v54 = vpop.f32.mrf.mxu1  ;;  %v2194_v20 = vadd.f32 %v2158_v2, %v2044_v31  ;;  %3314 = vmatmul.msk.f32.gmra.mxu2 %vm169_vm1, %v4516_v11 }
 0x23e   : > { %3331 = vmatmul.msk.f32.gmra.mxu3 %vm169_vm1, %v4520_v25 }
 0x23f   : > { %v4732_v13 = vadd.f32 %v2307_v23, %v2194_v20  ;;  %3348 = vmatmul.msk.f32.gmra.mxu0 %vm169_vm1, %v4266_v49  ;;  %v2813_v23 = vld [vmem:[#allocation2 + $0x182] sm:$0xff]  ;;  %v2814_v20 = vld [vmem:[#allocation2 + $0x18a] sm:$0xff] }
 0x240   : > { %3365 = vmatmul.msk.f32.gmra.mxu1 %vm169_vm1, %v4554_v61  ;;  %v1878_v15 = vpop.f32.mrf.mxu2 }
 0x241   : > { %v2011_v26 = vpop.f32.mrf.mxu3  ;;  %v1879_v40 = vadd.f32 %v1878_v15, %v4482_v9 }
 0x243   : > { %v2045_v12 = vadd.f32 %v2011_v26, %v1879_v40  ;;  %v4975_v40 = vld [vmem:[#allocation6_spill] sm:$0xff] }
 0x244   : > { %v2164_v18 = vpop.f32.mrf.mxu0 }
 0x245   : > { %v2313_v50 = vpop.f32.mrf.mxu1  ;;  %v2195_v24 = vadd.f32 %v2161_v44, %v2045_v12  ;;  %3315 = vmatmul.msk.f32.gmra.mxu2 %vm169_vm1, %v4534_v43 }
 0x246   : > { %3332 = vmatmul.msk.f32.gmra.mxu3 %vm169_vm1, %v4538_v62 }
 0x247   : > { %v4743_v11 = vadd.f32 %v2310_v54, %v2195_v24  ;;  %3349 = vmatmul.msk.f32.gmra.mxu0 %vm169_vm1, %v4281_v32 }
 0x248   : > { %3366 = vmatmul.msk.f32.gmra.mxu1 %vm169_vm1, %v4574_v42  ;;  %v1881_v49 = vpop.f32.mrf.mxu2 }
 0x249   : > { %v2014_v9 = vpop.f32.mrf.mxu3  ;;  %v1882_v25 = vadd.f32 %v1881_v49, %v4500_v59 }
 0x24b   : > { %v2046_v30 = vadd.f32 %v2014_v9, %v1882_v25  ;;  %v2666_v9 = vld [vmem:[#allocation2 + $0x199] sm:$0xff] }
 0x24c   : > { %v2167_v63 = vpop.f32.mrf.mxu0 }
 0x24d   : > { %v2316_v39 = vpop.f32.mrf.mxu1  ;;  %v2196_v4 = vadd.f32 %v2164_v18, %v2046_v30  ;;  %3316 = vmatmul.msk.f32.gmra.mxu2 %vm169_vm1, %v4554_v61  ;;  %v2517_v18 = vld [vmem:[#allocation2 + $0x198] sm:$0xff] }
 0x24e   : > { %3333 = vmatmul.msk.f32.gmra.mxu3 %vm169_vm1, %v4558_v7 }
 0x24f   : > { %v4754_v43 = vadd.f32 %v2313_v50, %v2196_v4  ;;  %3350 = vmatmul.msk.f32.gmra.mxu0 %vm169_vm1, %v4302_v1  ;;  %v2518_v4 = vld [vmem:[#allocation2 + $0x1a0] sm:$0xff] }
 0x250   : > { %3367 = vmatmul.msk.f32.gmra.mxu1 %vm169_vm1, %v4592_v6  ;;  %v1884_v32 = vpop.f32.mrf.mxu2 }
 0x251   : > { %v2017_v59 = vpop.f32.mrf.mxu3  ;;  %v1885_v62 = vadd.f32 %v1884_v32, %v4518_v60 }
 0x253   : > { %v2047_v56 = vadd.f32 %v2017_v59, %v1885_v62 }
 0x254   : > { %v2170_v55 = vpop.f32.mrf.mxu0 }
 0x255   : > { %v2319_v22 = vpop.f32.mrf.mxu1  ;;  %v2197_v5 = vadd.f32 %v2167_v63, %v2047_v56  ;;  %3317 = vmatmul.msk.f32.gmra.mxu2 %vm169_vm1, %v4574_v42  ;;  %v4976_v63 = vld [vmem:[#allocation11_spill] sm:$0xff]  ;;  %v2667_v56 = vld [vmem:[#allocation2 + $0x1a1] sm:$0xff] }
 0x256   : > { %3334 = vmatmul.msk.f32.gmra.mxu3 %vm169_vm1, %v4578_v34  ;;  %v4972_v34 = vld [vmem:[#allocation8_spill] sm:$0xff] }
 0x257   : > { %v4765_v61 = vadd.f32 %v2316_v39, %v2197_v5  ;;  %3351 = vmatmul.msk.f32.gmra.mxu0 %vm169_vm1, %v4327_v17 }
 0x258   : > { %3368 = vmatmul.msk.f32.gmra.mxu1 %vm169_vm1, %v4610_v10  ;;  %v1887_v1 = vpop.f32.mrf.mxu2 }
 0x259   : > { %v2020_v60 = vpop.f32.mrf.mxu3  ;;  %v1888_v7 = vadd.f32 %v1887_v1, %v4536_v51 }
 0x25b   : > { %v2048_v8 = vadd.f32 %v2020_v60, %v1888_v7  ;;  %v4977_v7 = vld [vmem:[#allocation13_spill] sm:$0xff] }
 0x25c   : > { %v2173_v52 = vpop.f32.mrf.mxu0 }
 0x25d   : > { %v2322_v27 = vpop.f32.mrf.mxu1  ;;  %v2198_v21 = vadd.f32 %v2170_v55, %v2048_v8  ;;  %3318 = vmatmul.msk.f32.gmra.mxu2 %vm169_vm1, %v4592_v6  ;;  %v2816_v55 = vld [vmem:[#allocation2 + $0x1a2] sm:$0xff] }
 0x25e   : > { %3335 = vmatmul.msk.f32.gmra.mxu3 %vm169_vm1, %v4596_v28  ;;  %v4973_v28 = vld [vmem:[#allocation9_spill] sm:$0xff] }
 0x25f   : > { %v4776_v42 = vadd.f32 %v2319_v22, %v2198_v21  ;;  %3352 = vmatmul.msk.f32.gmra.mxu0 %vm169_vm1, %v4344_v33 }
 0x260   : > { %3369 = vmatmul.msk.f32.gmra.mxu1 %vm169_vm1, %v4630_v47  ;;  %v1890_v17 = vpop.f32.mrf.mxu2 }
 0x261   : > { %v2023_v51 = vpop.f32.mrf.mxu3  ;;  %v1891_v37 = vadd.f32 %v1890_v17, %v4972_v34 }
 0x263   : > { %v2049_v58 = vadd.f32 %v2023_v51, %v1891_v37 }
 0x264   : > { %v2176_v36 = vpop.f32.mrf.mxu0 }
 0x265   : > { %v2325_v2 = vpop.f32.mrf.mxu1  ;;  %v2199_v6 = vadd.f32 %v2173_v52, %v2049_v58  ;;  %3319 = vmatmul.msk.f32.gmra.mxu2 %vm169_vm1, %v4610_v10 }
 0x266   : > { %3336 = vmatmul.msk.f32.gmra.mxu3 %vm169_vm1, %v4973_v28 }
 0x267   : > { %v4787_v14 = vadd.f32 %v2322_v27, %v2199_v6  ;;  %3353 = vmatmul.msk.f32.gmra.mxu0 %vm169_vm1, %v4616_v48 }
 0x268   : > { %3370 = vmatmul.msk.f32.gmra.mxu1 %vm169_vm1, %v2813_v23  ;;  %v1893_v33 = vpop.f32.mrf.mxu2 }
 0x269   : > { %v2026_v35 = vpop.f32.mrf.mxu3  ;;  %v1894_v38 = vadd.f32 %v1893_v33, %v4974_v3 }
 0x26b   : > { %v2050_v31 = vadd.f32 %v2026_v35, %v1894_v38 }
 0x26c   : > { %v2179_v44 = vpop.f32.mrf.mxu0 }
 0x26d   : > { %v2328_v54 = vpop.f32.mrf.mxu1  ;;  %v2200_v15 = vadd.f32 %v2176_v36, %v2050_v31  ;;  %3320 = vmatmul.msk.f32.gmra.mxu2 %vm169_vm1, %v4630_v47  ;;  %v2815_v47 = vld [vmem:[#allocation2 + $0x19a] sm:$0xff] }
 0x26e   : > { %3337 = vmatmul.msk.f32.gmra.mxu3 %vm169_vm1, %v4634_v16 }
 0x26f   : > { %v4797_v10 = vadd.f32 %v2325_v2, %v2200_v15  ;;  %3354 = vmatmul.msk.f32.gmra.mxu0 %vm169_vm1, %v4636_v45 }
 0x270   : > { %3371 = vmatmul.msk.f32.gmra.mxu1 %vm169_vm1, %v2814_v20  ;;  %v1896_v48 = vpop.f32.mrf.mxu2 }
 0x271   : > { %v2029_v26 = vpop.f32.mrf.mxu3  ;;  %v1897_v12 = vadd.f32 %v1896_v48, %v4975_v40 }
 0x273   : > { %v2051_v50 = vadd.f32 %v2029_v26, %v1897_v12 }
 0x274   : > { %v2182_v24 = vpop.f32.mrf.mxu0 }
 0x275   : > { %v2331_v49 = vpop.f32.mrf.mxu1  ;;  %v2201_v25 = vadd.f32 %v2179_v44, %v2051_v50  ;;  %3321 = vmatmul.msk.f32.gmra.mxu2 %vm169_vm1, %v2813_v23 }
 0x276   : > { %3338 = vmatmul.msk.f32.gmra.mxu3 %vm169_vm1, %v2517_v18 }
 0x277   : > { %v4805_v16 = vadd.f32 %v2328_v54, %v2201_v25  ;;  %3355 = vmatmul.msk.f32.gmra.mxu0 %vm169_vm1, %v2666_v9 }
 0x278   : > { %3372 = vmatmul.msk.f32.gmra.mxu1 %vm169_vm1, %v2815_v47  ;;  %v1899_v45 = vpop.f32.mrf.mxu2 }
 0x279   : > { %v2032_v30 = vpop.f32.mrf.mxu3  ;;  %v1900_v39 = vadd.f32 %v1899_v45, %v4976_v63 }
 0x27b   : > { %v2052_v32 = vadd.f32 %v2032_v30, %v1900_v39 }
 0x27c   : > { %v2185_v59 = vpop.f32.mrf.mxu0 }
 0x27d   : > { %v2334_v62 = vpop.f32.mrf.mxu1  ;;  %v2202_v22 = vadd.f32 %v2182_v24, %v2052_v32  ;;  %3322 = vmatmul.msk.f32.gmra.mxu2 %vm169_vm1, %v2814_v20 }
 0x27e   : > { %3339 = vmatmul.msk.f32.gmra.mxu3 %vm169_vm1, %v2518_v4 }
 0x27f   : > { %v4812_v5 = vadd.f32 %v2331_v49, %v2202_v22  ;;  %3356 = vmatmul.msk.f32.gmra.mxu0 %vm169_vm1, %v2667_v56 }
 0x280   : > { %3373 = vmatmul.msk.f32.gmra.mxu1 %vm169_vm1, %v2816_v55  ;;  %v1902_v1 = vpop.f32.mrf.mxu2 }
 0x281   : > { %v2035_v60 = vpop.f32.mrf.mxu3  ;;  %v1903_v8 = vadd.f32 %v1902_v1, %v4977_v7 }
 0x283   : > { %v2053_v52 = vadd.f32 %v2035_v60, %v1903_v8 }
 0x284   : > { %v2737_v27 = vpop.f32.mrf.mxu0 }
 0x285   : > { %v2886_v21 = vpop.f32.mrf.mxu1  ;;  %v2203_v17 = vadd.f32 %v2185_v59, %v2053_v52 }
 0x287   : > { %v4817_v51 = vadd.f32 %v2334_v62, %v2203_v17 }
 0x288   : > { %v2438_v34 = vpop.f32.mrf.mxu2 }
 0x289   : > { %v2588_v37 = vpop.f32.mrf.mxu3  ;;  %v2486_v58 = vadd.f32 %v2438_v34, %v4666_v46 }
 0x28b   : > { %v2636_v36 = vadd.f32 %v2588_v37, %v2486_v58 }
 0x28c   : > { %v2740_v2 = vpop.f32.mrf.mxu0 }
 0x28d   : > { %v2889_v23 = vpop.f32.mrf.mxu1  ;;  %v2785_v6 = vadd.f32 %v2737_v27, %v2636_v36 }
 0x28f   : > { %v2934_v28 = vadd.f32 %v2886_v21, %v2785_v6 }
 0x290   : > { %v2441_v33 = vpop.f32.mrf.mxu2 }
 0x291   : > { %v2591_v35 = vpop.f32.mrf.mxu3  ;;  %v2950_v3 = vadd.f32 %v4376_v53, %v2934_v28  ;;  %v2487_v38 = vadd.f32 %v2441_v33, %v4677_v0 }
 0x293   : > { %3374 = vst.msk [vmem:[%s4389_s8 + $0x80] sm:$0xff] %vm1621_vm3, %v2950_v3  ;;  %v2637_v31 = vadd.f32 %v2591_v35, %v2487_v38 }
 0x294   : > { %v2743_v44 = vpop.f32.mrf.mxu0 }
 0x295   : > { %v2892_v54 = vpop.f32.mrf.mxu1  ;;  %v2786_v20 = vadd.f32 %v2740_v2, %v2637_v31 }
 0x297   : > { %v2935_v46 = vadd.f32 %v2889_v23, %v2786_v20 }
 0x298   : > { %v2444_v15 = vpop.f32.mrf.mxu2 }
 0x299   : > { %v2594_v48 = vpop.f32.mrf.mxu3  ;;  %v2951_v26 = vadd.f32 %v4376_v53, %v2935_v46  ;;  %v2488_v40 = vadd.f32 %v2444_v15, %v4688_v57 }
 0x29b   : > { %3375 = vst.msk [vmem:[%s4389_s8 + $0x88] sm:$0xff] %vm1621_vm3, %v2951_v26  ;;  %v2638_v12 = vadd.f32 %v2594_v48, %v2488_v40  ;;  %v4851_v26 = vld [vmem:[%s4924_s2] ss:$0 sm:$0xff] }
 0x29c   : > { %v2746_v18 = vpop.f32.mrf.mxu0 }
 0x29d   : > { %v2895_v50 = vpop.f32.mrf.mxu1  ;;  %v2787_v0 = vadd.f32 %v2743_v44, %v2638_v12 }
 0x29f   : > { %v2936_v24 = vadd.f32 %v2892_v54, %v2787_v0 }
 0x2a0   : > { %v2447_v49 = vpop.f32.mrf.mxu2 }
 0x2a1   : > { %v2597_v9 = vpop.f32.mrf.mxu3  ;;  %v2952_v47 = vadd.f32 %v4376_v53, %v2936_v24  ;;  %v2489_v25 = vadd.f32 %v2447_v49, %v4699_v29 }
 0x2a3   : > { %3376 = vst.msk [vmem:[%s4389_s8 + $0x90] sm:$0xff] %vm1621_vm3, %v2952_v47  ;;  %v2639_v45 = vadd.f32 %v2597_v9, %v2489_v25 }
 0x2a4   : > { %v2749_v30 = vpop.f32.mrf.mxu0 }
 0x2a5   : > { %v2898_v63 = vpop.f32.mrf.mxu1  ;;  %v2788_v57 = vadd.f32 %v2746_v18, %v2639_v45 }
 0x2a7   : > { %v2937_v39 = vadd.f32 %v2895_v50, %v2788_v57 }
 0x2a8   : > { %v2450_v4 = vpop.f32.mrf.mxu2 }
 0x2a9   : > { %v2600_v32 = vpop.f32.mrf.mxu3  ;;  %v2953_v59 = vadd.f32 %v4376_v53, %v2937_v39  ;;  %v2490_v62 = vadd.f32 %v2450_v4, %v4710_v41 }
 0x2ab   : > { %3377 = vst.msk [vmem:[%s4389_s8 + $0x98] sm:$0xff] %vm1621_vm3, %v2953_v59  ;;  %v2640_v56 = vadd.f32 %v2600_v32, %v2490_v62 }
 0x2ac   : > { %v2752_v55 = vpop.f32.mrf.mxu0 }
 0x2ad   : > { %v2901_v22 = vpop.f32.mrf.mxu1  ;;  %v2789_v29 = vadd.f32 %v2749_v30, %v2640_v56 }
 0x2af   : > { %v2938_v1 = vadd.f32 %v2898_v63, %v2789_v29 }
 0x2b0   : > { %v2453_v60 = vpop.f32.mrf.mxu2 }
 0x2b1   : > { %v2603_v7 = vpop.f32.mrf.mxu3  ;;  %v2954_v8 = vadd.f32 %v4376_v53, %v2938_v1  ;;  %v2491_v52 = vadd.f32 %v2453_v60, %v4721_v19 }
 0x2b3   : > { %3378 = vst.msk [vmem:[%s4389_s8 + $0xa0] sm:$0xff] %vm1621_vm3, %v2954_v8  ;;  %v2641_v27 = vadd.f32 %v2603_v7, %v2491_v52 }
 0x2b4   : > { %v2755_v21 = vpop.f32.mrf.mxu0 }
 0x2b5   : > { %v2904_v17 = vpop.f32.mrf.mxu1  ;;  %v2790_v41 = vadd.f32 %v2752_v55, %v2641_v27 }
 0x2b7   : > { %v2939_v34 = vadd.f32 %v2901_v22, %v2790_v41 }
 0x2b8   : > { %v2456_v37 = vpop.f32.mrf.mxu2 }
 0x2b9   : > { %v2606_v58 = vpop.f32.mrf.mxu3  ;;  %v2955_v36 = vadd.f32 %v4376_v53, %v2939_v34  ;;  %v2492_v2 = vadd.f32 %v2456_v37, %v4732_v13 }
 0x2bb   : > { %3379 = vst.msk [vmem:[%s4389_s8 + $0xa8] sm:$0xff] %vm1621_vm3, %v2955_v36  ;;  %v2642_v23 = vadd.f32 %v2606_v58, %v2492_v2 }
 0x2bc   : > { %v2758_v6 = vpop.f32.mrf.mxu0 }
 0x2bd   : > { %v2907_v28 = vpop.f32.mrf.mxu1  ;;  %v2791_v19 = vadd.f32 %v2755_v21, %v2642_v23 }
 0x2bf   : > { %v2940_v33 = vadd.f32 %v2904_v17, %v2791_v19 }
 0x2c0   : > { %v2459_v35 = vpop.f32.mrf.mxu2 }
 0x2c1   : > { %v2609_v3 = vpop.f32.mrf.mxu3  ;;  %v2956_v38 = vadd.f32 %v4376_v53, %v2940_v33  ;;  %v2493_v31 = vadd.f32 %v2459_v35, %v4743_v11 }
 0x2c3   : > { %3380 = vst.msk [vmem:[%s4389_s8 + $0xb0] sm:$0xff] %vm1621_vm3, %v2956_v38  ;;  %v2643_v44 = vadd.f32 %v2609_v3, %v2493_v31 }
 0x2c4   : > { %v2761_v54 = vpop.f32.mrf.mxu0 }
 0x2c5   : > { %v2910_v20 = vpop.f32.mrf.mxu1  ;;  %v2792_v13 = vadd.f32 %v2758_v6, %v2643_v44 }
 0x2c7   : > { %v2941_v46 = vadd.f32 %v2907_v28, %v2792_v13 }
 0x2c8   : > { %v2462_v15 = vpop.f32.mrf.mxu2 }
 0x2c9   : > { %v2612_v48 = vpop.f32.mrf.mxu3  ;;  %v2957_v40 = vadd.f32 %v4851_v26, %v2941_v46  ;;  %v2494_v53 = vadd.f32 %v2462_v15, %v4754_v43 }
 0x2cb   : > { %3381 = vst.msk [vmem:[%s4389_s8 + $0xb8] sm:$0xff] %vm1621_vm3, %v2957_v40  ;;  %v2644_v11 = vadd.f32 %v2612_v48, %v2494_v53 }
 0x2cc   : > { %v2764_v12 = vpop.f32.mrf.mxu0 }
 0x2cd   : > { %v2913_v18 = vpop.f32.mrf.mxu1  ;;  %v2793_v50 = vadd.f32 %v2761_v54, %v2644_v11 }
 0x2cf   : > { %v2942_v0 = vadd.f32 %v2910_v20, %v2793_v50 }
 0x2d0   : > { %v2465_v24 = vpop.f32.mrf.mxu2 }
 0x2d1   : > { %v2615_v49 = vpop.f32.mrf.mxu3  ;;  %v2958_v9 = vadd.f32 %v4851_v26, %v2942_v0  ;;  %v2495_v47 = vadd.f32 %v2465_v24, %v4765_v61 }
 0x2d3   : > { %3382 = vst.msk [vmem:[%s4389_s8 + $0xc0] sm:$0xff] %vm1621_vm3, %v2958_v9  ;;  %v2645_v25 = vadd.f32 %v2615_v49, %v2495_v47 }
 0x2d4   : > { %v2767_v45 = vpop.f32.mrf.mxu0 }
 0x2d5   : > { %v2916_v30 = vpop.f32.mrf.mxu1  ;;  %v2794_v43 = vadd.f32 %v2764_v12, %v2645_v25 }
 0x2d7   : > { %v2943_v63 = vadd.f32 %v2913_v18, %v2794_v43 }
 0x2d8   : > { %v2468_v57 = vpop.f32.mrf.mxu2 }
 0x2d9   : > { %v2618_v39 = vpop.f32.mrf.mxu3  ;;  %v2959_v4 = vadd.f32 %v4851_v26, %v2943_v63  ;;  %v2496_v32 = vadd.f32 %v2468_v57, %v4776_v42 }
 0x2db   : > { %3383 = vst.msk [vmem:[%s4389_s8 + $0xc8] sm:$0xff] %vm1621_vm3, %v2959_v4  ;;  %v2646_v59 = vadd.f32 %v2618_v39, %v2496_v32 }
 0x2dc   : > { %v2770_v62 = vpop.f32.mrf.mxu0 }
 0x2dd   : > { %v2919_v56 = vpop.f32.mrf.mxu1  ;;  %v2795_v61 = vadd.f32 %v2767_v45, %v2646_v59 }
 0x2df   : > { %v2944_v55 = vadd.f32 %v2916_v30, %v2795_v61 }
 0x2e0   : > { %v2471_v22 = vpop.f32.mrf.mxu2 }
 0x2e1   : > { %v2621_v29 = vpop.f32.mrf.mxu3  ;;  %v2960_v1 = vadd.f32 %v4851_v26, %v2944_v55  ;;  %v2497_v60 = vadd.f32 %v2471_v22, %v4787_v14 }
 0x2e3   : > { %3384 = vst.msk [vmem:[%s4389_s8 + $0xd0] sm:$0xff] %vm1621_vm3, %v2960_v1  ;;  %v2647_v7 = vadd.f32 %v2621_v29, %v2497_v60 }
 0x2e4   : > { %v2773_v8 = vpop.f32.mrf.mxu0 }
 0x2e5   : > { %v2796_v52 = vadd.f32 %v2770_v62, %v2647_v7  ;;  %v2922_v42 = vpop.f32.mrf.mxu1 }
 0x2e7   : > { %v2945_v27 = vadd.f32 %v2919_v56, %v2796_v52 }
 0x2e8   : > { %v2474_v21 = vpop.f32.mrf.mxu2 }
 0x2e9   : > { %v2624_v17 = vpop.f32.mrf.mxu3  ;;  %v2961_v41 = vadd.f32 %v4851_v26, %v2945_v27  ;;  %v2498_v34 = vadd.f32 %v2474_v21, %v4797_v10 }
 0x2eb   : > { %3385 = vst.msk [vmem:[%s4389_s8 + $0xd8] sm:$0xff] %vm1621_vm3, %v2961_v41  ;;  %v2648_v37 = vadd.f32 %v2624_v17, %v2498_v34 }
 0x2ec   : > { %v2776_v36 = vpop.f32.mrf.mxu0 }
 0x2ed   : > { %v2797_v58 = vadd.f32 %v2773_v8, %v2648_v37  ;;  %v2925_v2 = vpop.f32.mrf.mxu1 }
 0x2ef   : > { %v2946_v14 = vadd.f32 %v2922_v42, %v2797_v58 }
 0x2f0   : > { %v2477_v23 = vpop.f32.mrf.mxu2 }
 0x2f1   : > { %v2627_v6 = vpop.f32.mrf.mxu3  ;;  %v2962_v28 = vadd.f32 %v4851_v26, %v2946_v14  ;;  %v2499_v19 = vadd.f32 %v2477_v23, %v4805_v16 }
 0x2f3   : > { %3386 = vst.msk [vmem:[%s4389_s8 + $0xe0] sm:$0xff] %vm1621_vm3, %v2962_v28  ;;  %v2649_v33 = vadd.f32 %v2627_v6, %v2499_v19 }
 0x2f4   : > { %v2779_v3 = vpop.f32.mrf.mxu0 }
 0x2f5   : > { %v2798_v35 = vadd.f32 %v2776_v36, %v2649_v33  ;;  %v2928_v20 = vpop.f32.mrf.mxu1 }
 0x2f7   : > { %v2947_v10 = vadd.f32 %v2925_v2, %v2798_v35 }
 0x2f8   : > { %v2480_v38 = vpop.f32.mrf.mxu2 }
 0x2f9   : > { %v2630_v31 = vpop.f32.mrf.mxu3  ;;  %v2963_v44 = vadd.f32 %v4851_v26, %v2947_v10  ;;  %v2500_v54 = vadd.f32 %v2480_v38, %v4812_v5 }
 0x2fb   : > { %3387 = vst.msk [vmem:[%s4389_s8 + $0xe8] sm:$0xff] %vm1621_vm3, %v2963_v44  ;;  %v2650_v13 = vadd.f32 %v2630_v31, %v2500_v54 }
 0x2fc   : > { %v2782_v11 = vpop.f32.mrf.mxu0 }
 0x2fd   : > { %v2799_v46 = vadd.f32 %v2779_v3, %v2650_v13  ;;  %v2931_v12 = vpop.f32.mrf.mxu1 }
 0x2ff   : > { %v2948_v16 = vadd.f32 %v2928_v20, %v2799_v46 }
 0x300   : > { %v2483_v15 = vpop.f32.mrf.mxu2 }
 0x301   : > { %v2633_v48 = vpop.f32.mrf.mxu3  ;;  %v2964_v40 = vadd.f32 %v4851_v26, %v2948_v16  ;;  %v2501_v53 = vadd.f32 %v2483_v15, %v4817_v51 }
 0x303   : > { %3388 = vst.msk [vmem:[%s4389_s8 + $0xf0] sm:$0xff] %vm1621_vm3, %v2964_v40  ;;  %v2651_v5 = vadd.f32 %v2633_v48, %v2501_v53 }
 0x305   : > { %v2800_v18 = vadd.f32 %v2782_v11, %v2651_v5 }
 0x307   : > { %v2949_v50 = vadd.f32 %v2931_v12, %v2800_v18 }
 0x309   : > { %v2965_v0 = vadd.f32 %v4851_v26, %v2949_v50 }
 0x30b   : > { %3389 = vst.msk [vmem:[%s4389_s8 + $0xf8] sm:$0xff] %vm1621_vm3, %v2965_v0 }
 0x30c   : > { %3470 = shalt.err (!%p3467_p3)
}
 0x30d   : > { %s3508_s30 = smov 128   ;;  %s3509_s7 = smov 8  }
 0x30e   : > { %3399 = dma.vmem_to_hbm [thread:$0]  (%p3568_p5), %s2997_s16, 4096, %s2999_s20, %s2984_s24, %s3508_s30, %s3508_s30, %s3509_s7  }
 0x30f PF: > { %p3405_p4 = scmp.ge.s32.totalorder %s3505_s15, 2  ;;  %s3013_s8 = sand.u32 1, %s3493_s12  }
 0x310   : > { %s3014_s5 = scalar_lea.sflag [#allocation4], %s3013_s8 }
 0x311   : > { %p3402_p7 = pnand %p3405_p4, %p3572_p6 }
 0x313   : > { %p3403_p8 = pneg %p3402_p7 }
 0x315   : > { %3488 = dma.done.wait (%p3403_p8), %s3014_s5, 4096  }
 0x316   : > { %3490 = vsyncadd (%p3403_p8), %s3014_s5, 4294963200  ;;  %p13_p9 = scmp.ge.s32.totalorder %s3555_s18, 4   ;;  %s4978_s12 = smov %s3497_s13 }
 0x317   : > { %s4979_s13 = smov %s3501_s14  ;;  %s4980_s14 = smov %s3566_s21 }
 0x318   : > { %s4981_s15 = smov %s3555_s18  ;;  %15 = sbr.rel (!%p13_p9) target bundleno = 3 (0x3), region = 73 }
 0x31d   :  { %3020 = vsyncpa [#allocation4], 1 }
 0x31e   :  { %3022 = vsyncpa [#allocation4 + $0x1], 1 }

</bundles_post_ra>
